<compile_context>
chip_gen: v5e
topology: v5e:2x2
jax: 0.10.0
libtpu: 0.0.40
codegen_flags: <defaults>
</compile_context>

<pallas_src>
import functools

import jax
import jax.numpy as jnp
import numpy as np
from jax.experimental import pallas as pl
from jax.experimental.pallas import tpu as pltpu


def _elu(x):
    # nn.ELU(alpha=1.0)
    return jnp.where(x > 0, x, jnp.exp(jnp.minimum(x, 0.0)) - 1.0)


def _news_kernel(emb_ref,
                 w1_ref, b1_ref, w2_ref, b2_ref, w3_ref, b3_ref, w4_ref, b4_ref,
                 fw1_ref, fb1_ref, fw2_ref, fb2_ref,
                 out_ref,
                 s1, s2, s3, s4,
                 *, TB, L, K, apply_softmax):
    def mm(a, b):
        # MXU matmul; operands cast to the weight's dtype, accumulate in f32.
        return jnp.dot(a.astype(b.dtype), b, preferred_element_type=jnp.float32)

    # ---- conv1: Conv1d(E -> C, k=3, stride=1) + ELU.  pitch L -> L ----
    L1 = L - K + 1                       # valid length per example
    N1 = (TB - 1) * L + L1               # flat rows actually computed
    xs = jnp.concatenate([emb_ref[pl.ds(k, N1), :] for k in range(K)], axis=-1)
    s1[pl.ds(0, N1), :] = _elu(mm(xs, w1_ref[...]) + b1_ref[...])

    # ---- conv2: Conv1d(C -> C, k=3, stride=2) + ELU.  pitch L -> L//2 ----
    P2 = L // 2
    L2 = (L1 - K) // 2 + 1
    N2 = (TB - 1) * P2 + L2
    xs = jnp.concatenate([s1[pl.ds(k, N2, 2), :] for k in range(K)], axis=-1)
    s2[pl.ds(0, N2), :] = _elu(mm(xs, w2_ref[...]) + b2_ref[...])

    # ---- conv3: Conv1d(C -> C, k=3, stride=2) + ELU.  pitch L//2 -> L//4 ----
    P3 = P2 // 2
    L3 = (L2 - K) // 2 + 1
    N3 = (TB - 1) * P3 + L3
    xs = jnp.concatenate([s2[pl.ds(k, N3, 2), :] for k in range(K)], axis=-1)
    s3[pl.ds(0, N3), :] = _elu(mm(xs, w3_ref[...]) + b3_ref[...])

    # ---- conv4: Conv1d(C -> C, k=3, stride=1) + ELU.  pitch L//4 ----
    L4 = L3 - K + 1
    N4 = (TB - 1) * P3 + L4
    xs = jnp.concatenate([s3[pl.ds(k, N4), :] for k in range(K)], axis=-1)
    s4[pl.ds(0, N4), :] = _elu(mm(xs, w4_ref[...]) + b4_ref[...])

    # ---- avg_pool1d over the L4 valid positions of each example ----
    pooled = s4[pl.ds(0, TB, P3), :]                 # row t=0 of every example
    for t in range(1, L4):
        pooled = pooled + s4[pl.ds(t, TB, P3), :]
    pooled = pooled * (1.0 / L4)                     # (TB, C) f32

    # TODO(synk): F.dropout (training=True by default in the PyTorch forward) is
    # stochastic; implemented as identity (inference behaviour).
    h = jnp.maximum(mm(pooled, fw1_ref[...]) + fb1_ref[...], 0.0)   # fc1 + ReLU
    out = mm(h, fw2_ref[...]) + fb2_ref[...]                        # fc2
    if apply_softmax:
        out = jax.nn.softmax(out, axis=-1)
    out_ref[0] = out.astype(out_ref.dtype)           # (TB, num_classes)


def news_classifier_forward(x_in, params, apply_softmax=False, block_b=4,
                            mxu_dtype=jnp.float32):
    # Embedding lookup (gather) is glue, done in plain JAX.  For a realistic
    # large-vocab model this gather could be fused into the kernel via
    # scalar-prefetched token ids + manual DMA; at these sizes it is not worth it.
    emb = params['embedding'][x_in].astype(jnp.float32)        # (B, L, E)
    B, L, E = emb.shape
    K = params['conv1_w'].shape[2]
    C = params['conv1_w'].shape[0]
    NC = params['fc2_w'].shape[0]
    assert K == 3 and L % 8 == 0 and L >= 24, "demo kernel assumes k=3, L % 8 == 0, L >= 24"

    TB = max(1, min(block_b, B))
    nb = pl.cdiv(B, TB)
    Bp = nb * TB
    if Bp != B:
        emb = jnp.concatenate([emb, jnp.zeros((Bp - B, L, E), emb.dtype)], axis=0)
    emb2d = emb.reshape(Bp * L, E).astype(mxu_dtype)           # flat (B*L, E) slab

    def cw(w):   # (Cout, Cin, K) -> (K*Cin, Cout): taps fused along the contraction dim
        return jnp.transpose(w, (2, 1, 0)).reshape(-1, w.shape[0]).astype(mxu_dtype)

    def rb(b):   # bias -> (1, n), kept f32 (added to the f32 matmul result)
        return b.reshape(1, -1).astype(jnp.float32)

    kin = (emb2d,
           cw(params['conv1_w']), rb(params['conv1_b']),
           cw(params['conv2_w']), rb(params['conv2_b']),
           cw(params['conv3_w']), rb(params['conv3_b']),
           cw(params['conv4_w']), rb(params['conv4_b']),
           params['fc1_w'].T.astype(mxu_dtype), rb(params['fc1_b']),
           params['fc2_w'].T.astype(mxu_dtype), rb(params['fc2_b']))

    def full_spec(a):
        nd = a.ndim
        return pl.BlockSpec(a.shape, lambda b, _nd=nd: (0,) * _nd)

    in_specs = [pl.BlockSpec((TB * L, E), lambda b: (b, 0))] + [full_spec(a) for a in kin[1:]]
    out_specs = pl.BlockSpec((1, TB, NC), lambda b: (b, 0, 0))

    out = pl.pallas_call(
        functools.partial(_news_kernel, TB=TB, L=L, K=K, apply_softmax=apply_softmax),
        grid=(nb,),
        in_specs=in_specs,
        out_specs=out_specs,
        out_shape=jax.ShapeDtypeStruct((nb, TB, NC), jnp.float32),
        scratch_shapes=[
            pltpu.VMEM((TB * L, C), jnp.float32),         # conv1 out (pitch L)
            pltpu.VMEM((TB * (L // 2), C), jnp.float32),  # conv2 out (pitch L//2)
            pltpu.VMEM((TB * (L // 4), C), jnp.float32),  # conv3 out (pitch L//4)
            pltpu.VMEM((TB * (L // 4), C), jnp.float32),  # conv4 out (pitch L//4)
        ],
        compiler_params=pltpu.CompilerParams(dimension_semantics=("parallel",)),
    )(*kin)
    return out.reshape(Bp, NC)[:B]


def reference_forward(x_in, params, apply_softmax=False):
    """Pure-JAX reference mirroring the PyTorch NCL forward exactly."""
    hp = jax.lax.Precision.HIGHEST
    x = params['embedding'][x_in]              # (B, L, E)
    x = jnp.transpose(x, (0, 2, 1))            # (B, E, L) == PyTorch permute(0, 2, 1)

    def conv(x, w, b, stride):
        y = jax.lax.conv_general_dilated(
            x, w, window_strides=(stride,), padding='VALID',
            dimension_numbers=('NCH', 'OIH', 'NCH'), precision=hp)
        return y + b[None, :, None]

    x = _elu(conv(x, params['conv1_w'], params['conv1_b'], 1))
    x = _elu(conv(x, params['conv2_w'], params['conv2_b'], 2))
    x = _elu(conv(x, params['conv3_w'], params['conv3_b'], 2))
    x = _elu(conv(x, params['conv4_w'], params['conv4_b'], 1))
    x = jnp.mean(x, axis=2)                    # avg_pool1d + squeeze -> (B, C)
    x = jnp.maximum(jnp.dot(x, params['fc1_w'].T, precision=hp) + params['fc1_b'], 0.0)
    out = jnp.dot(x, params['fc2_w'].T, precision=hp) + params['fc2_b']
    if apply_softmax:
        out = jax.nn.softmax(out, axis=-1)
    return out


if __name__ == "__main__":
    # Small, forward-consistent shapes.
    vocab, E, C, H, NC = 50, 16, 32, 32, 4     # vocabulary, embedding, channels, hidden, classes
    B, L = 8, 32                               # batch, sequence length

    key = jax.random.PRNGKey(0)
    ks = jax.random.split(key, 16)

    def init(k, shape, scale=0.1):
        return scale * jax.random.normal(k, shape, jnp.float32)

    params = {
        'embedding': init(ks[0], (vocab, E)).at[0].set(0.0),   # padding_idx=0 row is zero
        'conv1_w': init(ks[1], (C, E, 3)), 'conv1_b': init(ks[2], (C,)),
        'conv2_w': init(ks[3], (C, C, 3)), 'conv2_b': init(ks[4], (C,)),
        'conv3_w': init(ks[5], (C, C, 3)), 'conv3_b': init(ks[6], (C,)),
        'conv4_w': init(ks[7], (C, C, 3)), 'conv4_b': init(ks[8], (C,)),
        'fc1_w': init(ks[9], (H, C)), 'fc1_b': init(ks[10], (H,)),
        'fc2_w': init(ks[11], (NC, H)), 'fc2_b': init(ks[12], (NC,)),
    }
    x_in = jax.random.randint(ks[13], (B, L), 0, vocab, dtype=jnp.int32)

    ref = reference_forward(x_in, params, apply_softmax=False)

    # f32 MXU path: close parity with the HIGHEST-precision JAX/PyTorch reference.
    out = news_classifier_forward(x_in, params, apply_softmax=False,
                                  block_b=4, mxu_dtype=jnp.float32)
    out = jax.block_until_ready(out)
    assert out.shape == (B, NC)
    np.testing.assert_allclose(np.asarray(out), np.asarray(ref), rtol=1e-2, atol=2e-3)

    # bf16 MXU operands (v6e/v7x fast path); elementwise math stays f32 in-kernel.
    out_bf16 = jax.block_until_ready(
        news_classifier_forward(x_in, params, apply_softmax=False,
                                block_b=4, mxu_dtype=jnp.bfloat16))
    np.testing.assert_allclose(np.asarray(out_bf16), np.asarray(ref), rtol=1e-1, atol=2e-2)

    print("KERNEL_OK")
</pallas_src>

<mosaic_0001>
module attributes {stable_mosaic.version = 11 : i64} {
  func.func @_news_kernel(%arg0: i32, %arg1: memref<128x16xf32, #tpu.memory_space<vmem>>, %arg2: memref<48x32xf32, #tpu.memory_space<vmem>>, %arg3: memref<1x32xf32, #tpu.memory_space<vmem>>, %arg4: memref<96x32xf32, #tpu.memory_space<vmem>>, %arg5: memref<1x32xf32, #tpu.memory_space<vmem>>, %arg6: memref<96x32xf32, #tpu.memory_space<vmem>>, %arg7: memref<1x32xf32, #tpu.memory_space<vmem>>, %arg8: memref<96x32xf32, #tpu.memory_space<vmem>>, %arg9: memref<1x32xf32, #tpu.memory_space<vmem>>, %arg10: memref<32x32xf32, #tpu.memory_space<vmem>>, %arg11: memref<1x32xf32, #tpu.memory_space<vmem>>, %arg12: memref<32x4xf32, #tpu.memory_space<vmem>>, %arg13: memref<1x4xf32, #tpu.memory_space<vmem>>, %arg14: memref<1x4x4xf32, #tpu.memory_space<vmem>>, %arg15: memref<128x32xf32, #tpu.memory_space<vmem>>, %arg16: memref<64x32xf32, #tpu.memory_space<vmem>>, %arg17: memref<32x32xf32, #tpu.memory_space<vmem>>, %arg18: memref<32x32xf32, #tpu.memory_space<vmem>>) attributes {dimension_semantics = [#tpu.dimension_semantics<parallel>], iteration_bounds = array<i64: 2>, scalar_prefetch = 0 : i64, scratch_operands = 4 : i64, tpu.core_type = #tpu.core_type<tc>, window_params = [{transform_indices = @transform_0, window_bounds = array<i64: 128, 16>}, {pipeline_mode = #tpu.pipeline_mode<synchronous>, transform_indices = @transform_1, window_bounds = array<i64: 48, 32>}, {pipeline_mode = #tpu.pipeline_mode<synchronous>, transform_indices = @transform_2, window_bounds = array<i64: 1, 32>}, {pipeline_mode = #tpu.pipeline_mode<synchronous>, transform_indices = @transform_3, window_bounds = array<i64: 96, 32>}, {pipeline_mode = #tpu.pipeline_mode<synchronous>, transform_indices = @transform_4, window_bounds = array<i64: 1, 32>}, {pipeline_mode = #tpu.pipeline_mode<synchronous>, transform_indices = @transform_5, window_bounds = array<i64: 96, 32>}, {pipeline_mode = #tpu.pipeline_mode<synchronous>, transform_indices = @transform_6, window_bounds = array<i64: 1, 32>}, {pipeline_mode = #tpu.pipeline_mode<synchronous>, transform_indices = @transform_7, window_bounds = array<i64: 96, 32>}, {pipeline_mode = #tpu.pipeline_mode<synchronous>, transform_indices = @transform_8, window_bounds = array<i64: 1, 32>}, {pipeline_mode = #tpu.pipeline_mode<synchronous>, transform_indices = @transform_9, window_bounds = array<i64: 32, 32>}, {pipeline_mode = #tpu.pipeline_mode<synchronous>, transform_indices = @transform_10, window_bounds = array<i64: 1, 32>}, {pipeline_mode = #tpu.pipeline_mode<synchronous>, transform_indices = @transform_11, window_bounds = array<i64: 32, 4>}, {pipeline_mode = #tpu.pipeline_mode<synchronous>, transform_indices = @transform_12, window_bounds = array<i64: 1, 4>}, {transform_indices = @transform_13, window_bounds = array<i64: 1, 4, 4>}]} {
    %c0 = arith.constant 0 : index
    %c0_0 = arith.constant 0 : index
    %0 = vector.load %arg1[%c0, %c0_0] : memref<128x16xf32, #tpu.memory_space<vmem>>, vector<126x16xf32>
    %c1 = arith.constant 1 : index
    %c0_1 = arith.constant 0 : index
    %1 = vector.load %arg1[%c1, %c0_1] : memref<128x16xf32, #tpu.memory_space<vmem>>, vector<126x16xf32>
    %c2 = arith.constant 2 : index
    %c0_2 = arith.constant 0 : index
    %2 = vector.load %arg1[%c2, %c0_2] : memref<128x16xf32, #tpu.memory_space<vmem>>, vector<126x16xf32>
    %3 = tpu.concatenate %0, %1, %2 in 1 : vector<126x16xf32>, vector<126x16xf32>, vector<126x16xf32> -> vector<126x48xf32>
    %c0_3 = arith.constant 0 : index
    %c0_4 = arith.constant 0 : index
    %4 = vector.load %arg2[%c0_3, %c0_4] : memref<48x32xf32, #tpu.memory_space<vmem>>, vector<48x32xf32>
    %cst = arith.constant dense<0.000000e+00> : vector<126x32xf32>
    %5 = tpu.matmul %3, %4, %cst {dimension_numbers = #tpu.dot_dimension_numbers<[1], [0], [0], [1], [0, 0, 1, 1], [], []>} : vector<126x48xf32>, vector<48x32xf32>, vector<126x32xf32> -> vector<126x32xf32>
    %c0_5 = arith.constant 0 : index
    %c0_6 = arith.constant 0 : index
    %6 = vector.load %arg3[%c0_5, %c0_6] : memref<1x32xf32, #tpu.memory_space<vmem>>, vector<1x32xf32>
    %7 = vector.broadcast %6 : vector<1x32xf32> to vector<126x32xf32>
    %8 = arith.addf %5, %7 : vector<126x32xf32>
    %cst_7 = arith.constant 0.000000e+00 : f32
    %9 = vector.broadcast %cst_7 : f32 to vector<126x32xf32>
    %10 = arith.cmpf ogt, %8, %9 : vector<126x32xf32>
    %cst_8 = arith.constant 0.000000e+00 : f32
    %11 = vector.broadcast %cst_8 : f32 to vector<126x32xf32>
    %12 = arith.minimumf %8, %11 : vector<126x32xf32>
    %13 = math.exp %12 : vector<126x32xf32>
    %cst_9 = arith.constant 1.000000e+00 : f32
    %14 = vector.broadcast %cst_9 : f32 to vector<126x32xf32>
    %15 = arith.subf %13, %14 : vector<126x32xf32>
    %16 = arith.select %10, %8, %15 : vector<126x32xi1>, vector<126x32xf32>
    %c0_10 = arith.constant 0 : index
    %c0_11 = arith.constant 0 : index
    %17 = vector.load %arg15[%c0_10, %c0_11] : memref<128x32xf32, #tpu.memory_space<vmem>>, vector<126x32xf32>
    tpu.vector_store %arg15[%c0_10, %c0_11], %16 {strides = array<i32>} : memref<128x32xf32, #tpu.memory_space<vmem>>, vector<126x32xf32>,
    %c0_12 = arith.constant 0 : index
    %c0_13 = arith.constant 0 : index
    %18 = tpu.strided_load %arg15[%c0_12, %c0_13] {strides = array<i32: 2, 1>} : memref<128x32xf32, #tpu.memory_space<vmem>>, vector<62x32xf32>
    %c1_14 = arith.constant 1 : index
    %c0_15 = arith.constant 0 : index
    %19 = tpu.strided_load %arg15[%c1_14, %c0_15] {strides = array<i32: 2, 1>} : memref<128x32xf32, #tpu.memory_space<vmem>>, vector<62x32xf32>
    %c2_16 = arith.constant 2 : index
    %c0_17 = arith.constant 0 : index
    %20 = tpu.strided_load %arg15[%c2_16, %c0_17] {strides = array<i32: 2, 1>} : memref<128x32xf32, #tpu.memory_space<vmem>>, vector<62x32xf32>
    %21 = tpu.concatenate %18, %19, %20 in 1 : vector<62x32xf32>, vector<62x32xf32>, vector<62x32xf32> -> vector<62x96xf32>
    %c0_18 = arith.constant 0 : index
    %c0_19 = arith.constant 0 : index
    %22 = vector.load %arg4[%c0_18, %c0_19] : memref<96x32xf32, #tpu.memory_space<vmem>>, vector<96x32xf32>
    %cst_20 = arith.constant dense<0.000000e+00> : vector<62x32xf32>
    %23 = tpu.matmul %21, %22, %cst_20 {dimension_numbers = #tpu.dot_dimension_numbers<[1], [0], [0], [1], [0, 0, 1, 1], [], []>} : vector<62x96xf32>, vector<96x32xf32>, vector<62x32xf32> -> vector<62x32xf32>
    %c0_21 = arith.constant 0 : index
    %c0_22 = arith.constant 0 : index
    %24 = vector.load %arg5[%c0_21, %c0_22] : memref<1x32xf32, #tpu.memory_space<vmem>>, vector<1x32xf32>
    %25 = vector.broadcast %24 : vector<1x32xf32> to vector<62x32xf32>
    %26 = arith.addf %23, %25 : vector<62x32xf32>
    %cst_23 = arith.constant 0.000000e+00 : f32
    %27 = vector.broadcast %cst_23 : f32 to vector<62x32xf32>
    %28 = arith.cmpf ogt, %26, %27 : vector<62x32xf32>
    %cst_24 = arith.constant 0.000000e+00 : f32
    %29 = vector.broadcast %cst_24 : f32 to vector<62x32xf32>
    %30 = arith.minimumf %26, %29 : vector<62x32xf32>
    %31 = math.exp %30 : vector<62x32xf32>
    %cst_25 = arith.constant 1.000000e+00 : f32
    %32 = vector.broadcast %cst_25 : f32 to vector<62x32xf32>
    %33 = arith.subf %31, %32 : vector<62x32xf32>
    %34 = arith.select %28, %26, %33 : vector<62x32xi1>, vector<62x32xf32>
    %c0_26 = arith.constant 0 : index
    %c0_27 = arith.constant 0 : index
    %35 = vector.load %arg16[%c0_26, %c0_27] : memref<64x32xf32, #tpu.memory_space<vmem>>, vector<62x32xf32>
    tpu.vector_store %arg16[%c0_26, %c0_27], %34 {strides = array<i32>} : memref<64x32xf32, #tpu.memory_space<vmem>>, vector<62x32xf32>,
    %c0_28 = arith.constant 0 : index
    %c0_29 = arith.constant 0 : index
    %36 = tpu.strided_load %arg16[%c0_28, %c0_29] {strides = array<i32: 2, 1>} : memref<64x32xf32, #tpu.memory_space<vmem>>, vector<30x32xf32>
    %c1_30 = arith.constant 1 : index
    %c0_31 = arith.constant 0 : index
    %37 = tpu.strided_load %arg16[%c1_30, %c0_31] {strides = array<i32: 2, 1>} : memref<64x32xf32, #tpu.memory_space<vmem>>, vector<30x32xf32>
    %c2_32 = arith.constant 2 : index
    %c0_33 = arith.constant 0 : index
    %38 = tpu.strided_load %arg16[%c2_32, %c0_33] {strides = array<i32: 2, 1>} : memref<64x32xf32, #tpu.memory_space<vmem>>, vector<30x32xf32>
    %39 = tpu.concatenate %36, %37, %38 in 1 : vector<30x32xf32>, vector<30x32xf32>, vector<30x32xf32> -> vector<30x96xf32>
    %c0_34 = arith.constant 0 : index
    %c0_35 = arith.constant 0 : index
    %40 = vector.load %arg6[%c0_34, %c0_35] : memref<96x32xf32, #tpu.memory_space<vmem>>, vector<96x32xf32>
    %cst_36 = arith.constant dense<0.000000e+00> : vector<30x32xf32>
    %41 = tpu.matmul %39, %40, %cst_36 {dimension_numbers = #tpu.dot_dimension_numbers<[1], [0], [0], [1], [0, 0, 1, 1], [], []>} : vector<30x96xf32>, vector<96x32xf32>, vector<30x32xf32> -> vector<30x32xf32>
    %c0_37 = arith.constant 0 : index
    %c0_38 = arith.constant 0 : index
    %42 = vector.load %arg7[%c0_37, %c0_38] : memref<1x32xf32, #tpu.memory_space<vmem>>, vector<1x32xf32>
    %43 = vector.broadcast %42 : vector<1x32xf32> to vector<30x32xf32>
    %44 = arith.addf %41, %43 : vector<30x32xf32>
    %cst_39 = arith.constant 0.000000e+00 : f32
    %45 = vector.broadcast %cst_39 : f32 to vector<30x32xf32>
    %46 = arith.cmpf ogt, %44, %45 : vector<30x32xf32>
    %cst_40 = arith.constant 0.000000e+00 : f32
    %47 = vector.broadcast %cst_40 : f32 to vector<30x32xf32>
    %48 = arith.minimumf %44, %47 : vector<30x32xf32>
    %49 = math.exp %48 : vector<30x32xf32>
    %cst_41 = arith.constant 1.000000e+00 : f32
    %50 = vector.broadcast %cst_41 : f32 to vector<30x32xf32>
    %51 = arith.subf %49, %50 : vector<30x32xf32>
    %52 = arith.select %46, %44, %51 : vector<30x32xi1>, vector<30x32xf32>
    %c0_42 = arith.constant 0 : index
    %c0_43 = arith.constant 0 : index
    %53 = vector.load %arg17[%c0_42, %c0_43] : memref<32x32xf32, #tpu.memory_space<vmem>>, vector<30x32xf32>
    tpu.vector_store %arg17[%c0_42, %c0_43], %52 {strides = array<i32>} : memref<32x32xf32, #tpu.memory_space<vmem>>, vector<30x32xf32>,
    %c0_44 = arith.constant 0 : index
    %c0_45 = arith.constant 0 : index
    %54 = vector.load %arg17[%c0_44, %c0_45] : memref<32x32xf32, #tpu.memory_space<vmem>>, vector<28x32xf32>
    %c1_46 = arith.constant 1 : index
    %c0_47 = arith.constant 0 : index
    %55 = vector.load %arg17[%c1_46, %c0_47] : memref<32x32xf32, #tpu.memory_space<vmem>>, vector<28x32xf32>
    %c2_48 = arith.constant 2 : index
    %c0_49 = arith.constant 0 : index
    %56 = vector.load %arg17[%c2_48, %c0_49] : memref<32x32xf32, #tpu.memory_space<vmem>>, vector<28x32xf32>
    %57 = tpu.concatenate %54, %55, %56 in 1 : vector<28x32xf32>, vector<28x32xf32>, vector<28x32xf32> -> vector<28x96xf32>
    %c0_50 = arith.constant 0 : index
    %c0_51 = arith.constant 0 : index
    %58 = vector.load %arg8[%c0_50, %c0_51] : memref<96x32xf32, #tpu.memory_space<vmem>>, vector<96x32xf32>
    %cst_52 = arith.constant dense<0.000000e+00> : vector<28x32xf32>
    %59 = tpu.matmul %57, %58, %cst_52 {dimension_numbers = #tpu.dot_dimension_numbers<[1], [0], [0], [1], [0, 0, 1, 1], [], []>} : vector<28x96xf32>, vector<96x32xf32>, vector<28x32xf32> -> vector<28x32xf32>
    %c0_53 = arith.constant 0 : index
    %c0_54 = arith.constant 0 : index
    %60 = vector.load %arg9[%c0_53, %c0_54] : memref<1x32xf32, #tpu.memory_space<vmem>>, vector<1x32xf32>
    %61 = vector.broadcast %60 : vector<1x32xf32> to vector<28x32xf32>
    %62 = arith.addf %59, %61 : vector<28x32xf32>
    %cst_55 = arith.constant 0.000000e+00 : f32
    %63 = vector.broadcast %cst_55 : f32 to vector<28x32xf32>
    %64 = arith.cmpf ogt, %62, %63 : vector<28x32xf32>
    %cst_56 = arith.constant 0.000000e+00 : f32
    %65 = vector.broadcast %cst_56 : f32 to vector<28x32xf32>
    %66 = arith.minimumf %62, %65 : vector<28x32xf32>
    %67 = math.exp %66 : vector<28x32xf32>
    %cst_57 = arith.constant 1.000000e+00 : f32
    %68 = vector.broadcast %cst_57 : f32 to vector<28x32xf32>
    %69 = arith.subf %67, %68 : vector<28x32xf32>
    %70 = arith.select %64, %62, %69 : vector<28x32xi1>, vector<28x32xf32>
    %c0_58 = arith.constant 0 : index
    %c0_59 = arith.constant 0 : index
    %71 = vector.load %arg18[%c0_58, %c0_59] : memref<32x32xf32, #tpu.memory_space<vmem>>, vector<28x32xf32>
    tpu.vector_store %arg18[%c0_58, %c0_59], %70 {strides = array<i32>} : memref<32x32xf32, #tpu.memory_space<vmem>>, vector<28x32xf32>,
    %c0_60 = arith.constant 0 : index
    %c0_61 = arith.constant 0 : index
    %72 = tpu.strided_load %arg18[%c0_60, %c0_61] {strides = array<i32: 8, 1>} : memref<32x32xf32, #tpu.memory_space<vmem>>, vector<4x32xf32>
    %c1_62 = arith.constant 1 : index
    %c0_63 = arith.constant 0 : index
    %73 = tpu.strided_load %arg18[%c1_62, %c0_63] {strides = array<i32: 8, 1>} : memref<32x32xf32, #tpu.memory_space<vmem>>, vector<4x32xf32>
    %74 = arith.addf %72, %73 : vector<4x32xf32>
    %c2_64 = arith.constant 2 : index
    %c0_65 = arith.constant 0 : index
    %75 = tpu.strided_load %arg18[%c2_64, %c0_65] {strides = array<i32: 8, 1>} : memref<32x32xf32, #tpu.memory_space<vmem>>, vector<4x32xf32>
    %76 = arith.addf %74, %75 : vector<4x32xf32>
    %c3 = arith.constant 3 : index
    %c0_66 = arith.constant 0 : index
    %77 = tpu.strided_load %arg18[%c3, %c0_66] {strides = array<i32: 8, 1>} : memref<32x32xf32, #tpu.memory_space<vmem>>, vector<4x32xf32>
    %78 = arith.addf %76, %77 : vector<4x32xf32>
    %cst_67 = arith.constant 2.500000e-01 : f32
    %79 = vector.broadcast %cst_67 : f32 to vector<4x32xf32>
    %80 = arith.mulf %78, %79 : vector<4x32xf32>
    %c0_68 = arith.constant 0 : index
    %c0_69 = arith.constant 0 : index
    %81 = vector.load %arg10[%c0_68, %c0_69] : memref<32x32xf32, #tpu.memory_space<vmem>>, vector<32x32xf32>
    %cst_70 = arith.constant dense<0.000000e+00> : vector<4x32xf32>
    %82 = tpu.matmul %80, %81, %cst_70 {dimension_numbers = #tpu.dot_dimension_numbers<[1], [0], [0], [1], [0, 0, 1, 1], [], []>} : vector<4x32xf32>, vector<32x32xf32>, vector<4x32xf32> -> vector<4x32xf32>
    %c0_71 = arith.constant 0 : index
    %c0_72 = arith.constant 0 : index
    %83 = vector.load %arg11[%c0_71, %c0_72] : memref<1x32xf32, #tpu.memory_space<vmem>>, vector<1x32xf32>
    %84 = vector.broadcast %83 : vector<1x32xf32> to vector<4x32xf32>
    %85 = arith.addf %82, %84 : vector<4x32xf32>
    %cst_73 = arith.constant 0.000000e+00 : f32
    %86 = vector.broadcast %cst_73 : f32 to vector<4x32xf32>
    %87 = arith.maximumf %85, %86 : vector<4x32xf32>
    %c0_74 = arith.constant 0 : index
    %c0_75 = arith.constant 0 : index
    %88 = vector.load %arg12[%c0_74, %c0_75] : memref<32x4xf32, #tpu.memory_space<vmem>>, vector<32x4xf32>
    %cst_76 = arith.constant dense<0.000000e+00> : vector<4x4xf32>
    %89 = tpu.matmul %87, %88, %cst_76 {dimension_numbers = #tpu.dot_dimension_numbers<[1], [0], [0], [1], [0, 0, 1, 1], [], []>} : vector<4x32xf32>, vector<32x4xf32>, vector<4x4xf32> -> vector<4x4xf32>
    %c0_77 = arith.constant 0 : index
    %c0_78 = arith.constant 0 : index
    %90 = vector.load %arg13[%c0_77, %c0_78] : memref<1x4xf32, #tpu.memory_space<vmem>>, vector<1x4xf32>
    %91 = vector.broadcast %90 : vector<1x4xf32> to vector<4x4xf32>
    %92 = arith.addf %89, %91 : vector<4x4xf32>
    %c0_79 = arith.constant 0 : index
    %c0_80 = arith.constant 0 : index
    %c0_81 = arith.constant 0 : index
    %93 = vector.load %arg14[%c0_79, %c0_80, %c0_81] : memref<1x4x4xf32, #tpu.memory_space<vmem>>, vector<1x4x4xf32>
    %94 = vector.shape_cast %93 : vector<1x4x4xf32> to vector<4x4xf32>
    %95 = vector.shape_cast %92 : vector<4x4xf32> to vector<1x4x4xf32>
    tpu.vector_store %arg14[%c0_79, %c0_80, %c0_81], %95 {strides = array<i32>} : memref<1x4x4xf32, #tpu.memory_space<vmem>>, vector<1x4x4xf32>,
    return
  }
  func.func @transform_0(%arg0: i32) -> (i32, i32) {
    %c0_i32 = arith.constant 0 : i32
    %c0_i32_0 = arith.constant 0 : i32
    return %arg0, %c0_i32 : i32, i32
  }
  func.func @transform_1(%arg0: i32) -> (i32, i32) {
    %c0_i32 = arith.constant 0 : i32
    %c0_i32_0 = arith.constant 0 : i32
    %c0_i32_1 = arith.constant 0 : i32
    return %c0_i32, %c0_i32_0 : i32, i32
  }
  func.func @transform_2(%arg0: i32) -> (i32, i32) {
    %c0_i32 = arith.constant 0 : i32
    %c0_i32_0 = arith.constant 0 : i32
    %c0_i32_1 = arith.constant 0 : i32
    return %c0_i32, %c0_i32_0 : i32, i32
  }
  func.func @transform_3(%arg0: i32) -> (i32, i32) {
    %c0_i32 = arith.constant 0 : i32
    %c0_i32_0 = arith.constant 0 : i32
    %c0_i32_1 = arith.constant 0 : i32
    return %c0_i32, %c0_i32_0 : i32, i32
  }
  func.func @transform_4(%arg0: i32) -> (i32, i32) {
    %c0_i32 = arith.constant 0 : i32
    %c0_i32_0 = arith.constant 0 : i32
    %c0_i32_1 = arith.constant 0 : i32
    return %c0_i32, %c0_i32_0 : i32, i32
  }
  func.func @transform_5(%arg0: i32) -> (i32, i32) {
    %c0_i32 = arith.constant 0 : i32
    %c0_i32_0 = arith.constant 0 : i32
    %c0_i32_1 = arith.constant 0 : i32
    return %c0_i32, %c0_i32_0 : i32, i32
  }
  func.func @transform_6(%arg0: i32) -> (i32, i32) {
    %c0_i32 = arith.constant 0 : i32
    %c0_i32_0 = arith.constant 0 : i32
    %c0_i32_1 = arith.constant 0 : i32
    return %c0_i32, %c0_i32_0 : i32, i32
  }
  func.func @transform_7(%arg0: i32) -> (i32, i32) {
    %c0_i32 = arith.constant 0 : i32
    %c0_i32_0 = arith.constant 0 : i32
    %c0_i32_1 = arith.constant 0 : i32
    return %c0_i32, %c0_i32_0 : i32, i32
  }
  func.func @transform_8(%arg0: i32) -> (i32, i32) {
    %c0_i32 = arith.constant 0 : i32
    %c0_i32_0 = arith.constant 0 : i32
    %c0_i32_1 = arith.constant 0 : i32
    return %c0_i32, %c0_i32_0 : i32, i32
  }
  func.func @transform_9(%arg0: i32) -> (i32, i32) {
    %c0_i32 = arith.constant 0 : i32
    %c0_i32_0 = arith.constant 0 : i32
    %c0_i32_1 = arith.constant 0 : i32
    return %c0_i32, %c0_i32_0 : i32, i32
  }
  func.func @transform_10(%arg0: i32) -> (i32, i32) {
    %c0_i32 = arith.constant 0 : i32
    %c0_i32_0 = arith.constant 0 : i32
    %c0_i32_1 = arith.constant 0 : i32
    return %c0_i32, %c0_i32_0 : i32, i32
  }
  func.func @transform_11(%arg0: i32) -> (i32, i32) {
    %c0_i32 = arith.constant 0 : i32
    %c0_i32_0 = arith.constant 0 : i32
    %c0_i32_1 = arith.constant 0 : i32
    return %c0_i32, %c0_i32_0 : i32, i32
  }
  func.func @transform_12(%arg0: i32) -> (i32, i32) {
    %c0_i32 = arith.constant 0 : i32
    %c0_i32_0 = arith.constant 0 : i32
    %c0_i32_1 = arith.constant 0 : i32
    return %c0_i32, %c0_i32_0 : i32, i32
  }
  func.func @transform_13(%arg0: i32) -> (i32, i32, i32) {
    %c0_i32 = arith.constant 0 : i32
    %c0_i32_0 = arith.constant 0 : i32
    %c0_i32_1 = arith.constant 0 : i32
    return %arg0, %c0_i32, %c0_i32_0 : i32, i32, i32
  }
}

</mosaic_0001>

<bundles_post_ra>
// kernel: tpu_custom_call.1
= control target key start
LH: loop header
LB: loop body
LE: loop exit
PB: predicated region body
PF: predicated region fallthrough
CT: control target
= control target key end

     0   :  { %s2452_s0 = inlined_call_operand.vmem [shape: f32[256,16], index: 0, kind: input, shape index: {}]   ;;  %s2453_s1 = inlined_call_operand.vmem [shape: f32[48,32], index: 1, kind: input, shape index: {}]   ;;  %s2454_s2 = inlined_call_operand.vmem [shape: f32[1,32], index: 2, kind: input, shape index: {}]   ;;  %s2455_s3 = inlined_call_operand.vmem [shape: f32[96,32], index: 3, kind: input, shape index: {}]   ;;  %s2456_s4 = inlined_call_operand.vmem [shape: f32[1,32], index: 4, kind: input, shape index: {}]   ;;  %s2457_s5 = inlined_call_operand.vmem [shape: f32[96,32], index: 5, kind: input, shape index: {}]   ;;  %s2458_s6 = inlined_call_operand.vmem [shape: f32[1,32], index: 6, kind: input, shape index: {}]   ;;  %s2459_s7 = inlined_call_operand.vmem [shape: f32[96,32], index: 7, kind: input, shape index: {}]   ;;  %s2460_s8 = inlined_call_operand.vmem [shape: f32[1,32], index: 8, kind: input, shape index: {}]   ;;  %s2461_s9 = inlined_call_operand.vmem [shape: f32[32,32], index: 9, kind: input, shape index: {}]   ;;  %s2462_s10 = inlined_call_operand.vmem [shape: f32[1,32], index: 10, kind: input, shape index: {}]   ;;  %s2463_s11 = inlined_call_operand.vmem [shape: f32[32,4], index: 11, kind: input, shape index: {}]   ;;  %s2464_s12 = inlined_call_operand.vmem [shape: f32[1,4], index: 12, kind: input, shape index: {}]   ;;  %s2465_s13 = inlined_call_operand.hbm [shape: f32[2,4,4], index: 13, kind: output, shape index: {}]  }
   0x1   :  { %2470 = sst [smem:[#allocation10_spill]] %s2452_s0 }
   0x2   :  { %2471 = sst [smem:[#allocation11_spill]] %s2453_s1 }
   0x3   :  { %2472 = sst [smem:[#allocation12_spill]] %s2454_s2 }
   0x4   :  { %2473 = sst [smem:[#allocation13_spill]] %s2455_s3 }
   0x5   :  { %18 = vsyncpa [#allocation7], 0 }
   0x6   :  { %20 = vsyncpa [#allocation7 + $0x1], 0  ;;  %s1929_s25 = smov 0   ;;  %s1931_s26 = smov 0  }
   0x7   :  { %s1933_s27 = smov 0   ;;  %s1935_s28 = smov 0  }
   0x8 LB: > { %s1950_s29 = sadd.s32 4294967295, %s1854_s28   ;;  %s1591_s30 = sadd.s32 4294967294, %s1854_s28   ;;  %s1854_s28 = sphi %s1935_s28, %s2487_s28   ;;  %s1850_s27 = sphi %s1933_s27, %s2486_s27   ;;  %s1846_s26 = sphi %s1931_s26, %s2485_s26   ;;  %s1842_s25 = sphi %s1929_s25, %s2484_s25  }
   0x9   : > { %s1954_s14 = sadd.s32 1, %s1854_s28   ;;  %s311_s15 = sadd.s32 1, %s1850_s27 }
   0xa   : > { %s308_s16 = ssub.s32 %s1854_s28, %s1954_s14  ;;  %p321_p0 = scmp.ne.s32.totalorder %s1850_s27, %s1846_s26 }
   0xb   : > { %p309_p1 = scmp.eq.s32.totalorder %s308_s16, 0  ;;  %p322_p2 = scmp.eq.s32.totalorder %s1950_s29, 1 }
   0xc   : > { %p327_p3 = scmp.ne.s32.totalorder %s1846_s26, %s1842_s25  ;;  %p328_p4 = scmp.eq.s32.totalorder %s1591_s30, 1 }
   0xd   : > { %s1965_s17 = scalar_select %p309_p1, %s1850_s27, %s311_s15  }
   0xe   : > { %p1967_p5 = por %p322_p2, %p321_p0  ;;  %p1971_p6 = por %p328_p4, %p327_p3 }
   0xf   : > { %2474 = sst [smem:[#allocation9_spill]] %s1965_s17  ;;  %p1594_p7 = scmp.ge.s32.totalorder %s1854_s28, 1 }
  0x10   : > { %p391_p8 = scmp.lt.s32.totalorder %s1854_s28, 3 }
  0x12   : > { %p392_p9 = pnand %p1594_p7, %p391_p8 }
  0x13   : > { %s1596_s20 = sshll.u32 (!%p392_p9), %s1950_s29, 4  ;;  %s2477_s0 = sld [smem:[#allocation10_spill]] (!%p392_p9) }
  0x14   : > { %395 = sbr.rel (%p392_p9) target bundleno = 1502 (0x5de), region = 72  ;;  %p436_p10 = scmp.lt.s32.totalorder (!%p392_p9), %s1596_s20, 31 }
  0x15   : > { %s1856_s30 = smov (!%p392_p9), 16   ;;  %s2468_s15 = smov (!%p392_p9), 32  }
  0x16   : > { %s2478_s1 = sld [smem:[#allocation11_spill]] (!%p392_p9)  ;;  %s2482_s17 = smov (!%p392_p9), 64  }
  0x17   : > { %s2479_s2 = sld [smem:[#allocation12_spill]] (!%p392_p9) }
  0x18   : > { %s2480_s3 = sld [smem:[#allocation13_spill]] (!%p392_p9) }
  0x19   : > { %s2489_s20 = smov (!%p436_p10, %s1596_s20), 31  ;;  %vm617_vm0 = vcmask 130048   ;;  %vm634_vm1 = vcmask 261120   ;;  %vm661_vm2 = vcmask 392192  }
  0x1a   : > { %s1597_s21 = sshll.u32 %s2489_s20, 3 }
  0x1b   : > { %s1981_s24 = scalar_lea.vmem %s2477_s0, %s1597_s21  ;;  %s2481_s0 = smov 32  }
  0x1c   : > { %v458_v0 = vld [vmem:[%s1981_s24 + $0x9] sm:$0xff]  ;;  %v457_v1 = vld [vmem:[%s1981_s24 + $0x1] sm:$0xff]  ;;  %v459_v2 = vld [vmem:[%s1981_s24 + $0x11] sm:$0xff]  ;;  %s1665_s21 = sshll.u32 %s1950_s29, 2 }
  0x1d   : > { %507 = vrot.lane.b32.xlu1 %v458_v0, %s1856_s30  ;;  %505 = vrot.lane.b32.xlu0 %v457_v1, %s1856_s30  ;;  %v474_v3 = vld [vmem:[%s1981_s24 + $0xa] sm:$0xff]  ;;  %v473_v4 = vld [vmem:[%s1981_s24 + $0x2] sm:$0xff] }
  0x1e   : > { %509 = vrot.lane.b32.xlu2 %v459_v2, %s1856_s30  ;;  %v475_v5 = vld [vmem:[%s1981_s24 + $0x12] sm:$0xff]  ;;  %v476_v6 = vld [vmem:[%s1981_s24 + $0x1a] sm:$0xff]  ;;  %v462_v9 = vld [vmem:[%s1981_s24 + $0x29] sm:$0xff] }
  0x1f   : > { %v460_v7 = vld [vmem:[%s1981_s24 + $0x19] sm:$0xff]  ;;  %v461_v8 = vld [vmem:[%s1981_s24 + $0x21] sm:$0xff]  ;;  %v478_v11 = vld [vmem:[%s1981_s24 + $0x2a] sm:$0xff] }
  0x20   : > { %v477_v10 = vld [vmem:[%s1981_s24 + $0x22] sm:$0xff]  ;;  %v479_v12 = vld [vmem:[%s1981_s24 + $0x32] sm:$0xff]  ;;  %v480_v16 = vld [vmem:[%s1981_s24 + $0x3a] sm:$0xff] }
  0x21   : > { %v463_v13 = vld [vmem:[%s1981_s24 + $0x31] sm:$0xff]  ;;  %v464_v14 = vld [vmem:[%s1981_s24 + $0x39] sm:$0xff]  ;;  %v481_v18 = vld [vmem:[%s1981_s24 + $0x42] sm:$0xff] }
  0x22   : > { %v467_v15 = vld [vmem:[%s1981_s24 + $0x51] sm:$0xff]  ;;  %v465_v19 = vld [vmem:[%s1981_s24 + $0x41] sm:$0xff]  ;;  %v468_v20 = vld [vmem:[%s1981_s24 + $0x59] sm:$0xff] }
  0x23   : > { %v483_v17 = vld [vmem:[%s1981_s24 + $0x52] sm:$0xff]  ;;  %v656_v21 = vld [vmem:[%s2478_s1 + $0x28] sm:$0xff]  ;;  %v484_v23 = vld [vmem:[%s1981_s24 + $0x5a] sm:$0xff] }
  0x24   : > { %720 = vmatpush.msra.mxu0 %v656_v21  ;;  %1668 = vmatpush.msra.mxu2 %v656_v21  ;;  %v466_v22 = vld [vmem:[%s1981_s24 + $0x49] sm:$0xff]  ;;  %v469_v25 = vld [vmem:[%s1981_s24 + $0x61] sm:$0xff]  ;;  %v471_v28 = vld [vmem:[%s1981_s24 + $0x71] sm:$0xff] }
  0x25   : > { %571 = vrot.lane.b32.xlu1 %v474_v3, %s2468_s15  ;;  %569 = vrot.lane.b32.xlu0 %v473_v4, %s2468_s15  ;;  %v482_v24 = vld [vmem:[%s1981_s24 + $0x4a] sm:$0xff]  ;;  %v485_v29 = vld [vmem:[%s1981_s24 + $0x62] sm:$0xff] }
  0x26   : > { %573 = vrot.lane.b32.xlu2 %v475_v5, %s2468_s15  ;;  %1669 = vmatpush.msra.mxu3 %v656_v21  ;;  %v470_v26 = vld [vmem:[%s1981_s24 + $0x69] sm:$0xff]  ;;  %v487_v30 = vld [vmem:[%s1981_s24 + $0x72] sm:$0xff]  ;;  %v488_v32 = vld [vmem:[%s1981_s24 + $0x7a] sm:$0x3f] }
  0x27   : > { %v486_v27 = vld [vmem:[%s1981_s24 + $0x6a] sm:$0xff]  ;;  %v472_v31 = vld [vmem:[%s1981_s24 + $0x79] sm:$0x3f]  ;;  %v655_v33 = vld [vmem:[%s2478_s1 + $0x20] sm:$0xff] }
  0x28   : > { %721 = vmatpush.msra.mxu0 %v655_v33  ;;  %v654_v34 = vld [vmem:[%s2478_s1 + $0x18] sm:$0xff]  ;;  %1670 = vmatpush.msra.mxu2 %v655_v33  ;;  %v653_v35 = vld [vmem:[%s2478_s1 + $0x10] sm:$0xff]  ;;  %v652_v36 = vld [vmem:[%s2478_s1 + $0x8] sm:$0xff] }
  0x29   : > { %1671 = vmatpush.msra.mxu3 %v655_v33  ;;  %v651_v37 = vld [vmem:[%s2478_s1] sm:$0xff]  ;;  %v442_v48 = vld [vmem:[%s1981_s24 + $0x8] sm:$0xff]  ;;  %v443_v54 = vld [vmem:[%s1981_s24 + $0x10] sm:$0xff] }
  0x2a   : > { %722 = vmatpush.msra.mxu0 %v654_v34  ;;  %1672 = vmatpush.msra.mxu2 %v654_v34  ;;  %v441_v43 = vld [vmem:[%s1981_s24] sm:$0xff]  ;;  %v444_v60 = vld [vmem:[%s1981_s24 + $0x18] sm:$0xff]  ;;  %v451_v4 = vld [vmem:[%s1981_s24 + $0x50] sm:$0xff] }
  0x2b   : > { %1673 = vmatpush.msra.mxu3 %v654_v34  ;;  %v445_v2 = vld [vmem:[%s1981_s24 + $0x20] sm:$0xff] }
  0x2c   : > { %723 = vmatpush.msra.mxu0 %v653_v35  ;;  %1674 = vmatpush.msra.mxu2 %v653_v35  ;;  %v449_v34 = vld [vmem:[%s1981_s24 + $0x40] sm:$0xff] }
  0x2d   : > { %575 = vrot.lane.b32.xlu1 %v476_v6, %s2468_s15  ;;  %511 = vrot.lane.b32.xlu0 %v460_v7, %s1856_s30 }
  0x2e   : > { %513 = vrot.lane.b32.xlu2 %v461_v8, %s1856_s30  ;;  %1675 = vmatpush.msra.mxu3 %v653_v35  ;;  %v453_v35 = vld [vmem:[%s1981_s24 + $0x60] sm:$0xff] }
  0x2f   : > { %724 = vmatpush.msra.mxu0 %v652_v36  ;;  %1676 = vmatpush.msra.mxu2 %v652_v36 }
  0x30   : > { %1677 = vmatpush.msra.mxu3 %v652_v36 }
  0x31   : > { %725 = vmatpush.msra.mxu0 %v651_v37  ;;  %1678 = vmatpush.msra.mxu2 %v651_v37 }
  0x32   : > { %1679 = vmatpush.msra.mxu3 %v651_v37 }
  0x35   : > { %515 = vrot.lane.b32.xlu1 %v462_v9, %s1856_s30  ;;  %577 = vrot.lane.b32.xlu0 %v477_v10, %s2468_s15 }
  0x36   : > { %579 = vrot.lane.b32.xlu2 %v478_v11, %s2468_s15  ;;  %v446_v11 = vld [vmem:[%s1981_s24 + $0x28] sm:$0xff] }
  0x3d   : > { %581 = vrot.lane.b32.xlu1 %v479_v12, %s2468_s15  ;;  %517 = vrot.lane.b32.xlu0 %v463_v13, %s1856_s30 }
  0x3e   : > { %519 = vrot.lane.b32.xlu2 %v464_v14, %s1856_s30 }
  0x45   : > { %525 = vrot.lane.b32.xlu1 %v467_v15, %s1856_s30  ;;  %583 = vrot.lane.b32.xlu0 %v480_v16, %s2468_s15  ;;  %v447_v16 = vld [vmem:[%s1981_s24 + $0x30] sm:$0xff] }
  0x46   : > { %589 = vrot.lane.b32.xlu2 %v483_v17, %s2468_s15  ;;  %v452_v17 = vld [vmem:[%s1981_s24 + $0x58] sm:$0xff] }
  0x4d   : > { %585 = vrot.lane.b32.xlu1 %v481_v18, %s2468_s15  ;;  %521 = vrot.lane.b32.xlu0 %v465_v19, %s1856_s30 }
  0x4e   : > { %527 = vrot.lane.b32.xlu2 %v468_v20, %s1856_s30 }
  0x55   : > { %523 = vrot.lane.b32.xlu1 %v466_v22, %s1856_s30  ;;  %591 = vrot.lane.b32.xlu0 %v484_v23, %s2468_s15 }
  0x56   : > { %587 = vrot.lane.b32.xlu2 %v482_v24, %s2468_s15 }
  0x5d   : > { %529 = vrot.lane.b32.xlu1 %v469_v25, %s1856_s30  ;;  %531 = vrot.lane.b32.xlu0 %v470_v26, %s1856_s30  ;;  %v448_v25 = vld [vmem:[%s1981_s24 + $0x38] sm:$0xff] }
  0x5e   : > { %595 = vrot.lane.b32.xlu2 %v486_v27, %s2468_s15 }
  0x65   : > { %533 = vrot.lane.b32.xlu1 %v471_v28, %s1856_s30  ;;  %593 = vrot.lane.b32.xlu0 %v485_v29, %s2468_s15  ;;  %v454_v28 = vld [vmem:[%s1981_s24 + $0x68] sm:$0xff] }
  0x66   : > { %597 = vrot.lane.b32.xlu2 %v487_v30, %s2468_s15 }
  0x6d   : > { %535 = vrot.lane.b32.xlu0 %v472_v31, %s1856_s30  ;;  %599 = vrot.lane.b32.xlu1 %v488_v32, %s2468_s15 }
  0x78   : > { %v510_v38 = vpop.permute.xlu2 %509 }
  0x79   : > { %v620_v56 = vsel %vm617_vm0, %v443_v54, %v510_v38  ;;  %v455_v38 = vld [vmem:[%s1981_s24 + $0x70] sm:$0xff]  ;;  %v2132_v54 = vld [vmem:[%s2479_s2] ss:$0 sm:$0xff] }
  0x80   : > { %v574_v39 = vpop.permute.xlu2 %573 }
  0x81   : > { %v637_v59 = vsel %vm634_vm1, %v620_v56, %v574_v39 }
  0x88   : > { %v514_v42 = vpop.permute.xlu2 %513 }
  0x89   : > { %v622_v3 = vsel %vm617_vm0, %v445_v2, %v514_v42 }
  0x8f   : > { %v508_v40 = vpop.permute.xlu1 %507  ;;  %v506_v41 = vpop.permute.xlu0 %505 }
  0x90   : > { %v618_v44 = vsel %vm617_vm0, %v441_v43, %v506_v41  ;;  %v580_v49 = vpop.permute.xlu2 %579  ;;  %v619_v50 = vsel %vm617_vm0, %v442_v48, %v508_v40  ;;  %v456_v48 = vld [vmem:[%s1981_s24 + $0x78] sm:$0x3f] }
  0x97   : > { %v572_v45 = vpop.permute.xlu1 %571  ;;  %v570_v46 = vpop.permute.xlu0 %569 }
  0x98   : > { %v635_v47 = vsel %vm634_vm1, %v618_v44, %v570_v46  ;;  %v636_v53 = vsel %vm634_vm1, %v619_v50, %v572_v45  ;;  %v520_v55 = vpop.permute.xlu2 %519  ;;  %v450_v46 = vld [vmem:[%s1981_s24 + $0x48] sm:$0xff]  ;;  %s2466_s24 = smov 64  }
  0x99   : > { %1598 = vmatmul.msk.f32.vlgmr.msra.gmra.mxu0 %vm661_vm2, %v635_v47  ;;  %v625_v27 = vsel %vm617_vm0, %v448_v25, %v520_v55 }
  0x9f   : > { %v576_v51 = vpop.permute.xlu1 %575  ;;  %v512_v52 = vpop.permute.xlu0 %511 }
  0xa0   : > { %v621_v61 = vsel %vm617_vm0, %v444_v60, %v512_v52  ;;  %v590_v62 = vpop.permute.xlu2 %589 }
  0xa1   : > { %1599 = vmatmul.msk.f32.gmra.mxu0 %vm661_vm2, %v636_v53  ;;  %v638_v1 = vsel %vm634_vm1, %v621_v61, %v576_v51 }
  0xa7   : > { %v516_v57 = vpop.permute.xlu1 %515  ;;  %v578_v58 = vpop.permute.xlu0 %577 }
  0xa8   : > { %v639_v8 = vsel %vm634_vm1, %v622_v3, %v578_v58  ;;  %v528_v9 = vpop.permute.xlu2 %527  ;;  %v623_v12 = vsel %vm617_vm0, %v446_v11, %v516_v57 }
  0xa9   : > { %1600 = vmatmul.msk.f32.gmra.mxu0 %vm661_vm2, %v637_v59  ;;  %v640_v15 = vsel %vm634_vm1, %v623_v12, %v580_v49  ;;  %v629_v20 = vsel %vm617_vm0, %v452_v17, %v528_v9 }
  0xaf   : > { %v582_v63 = vpop.permute.xlu1 %581  ;;  %v518_v0 = vpop.permute.xlu0 %517 }
  0xb0   : > { %v588_v18 = vpop.permute.xlu2 %587  ;;  %v624_v19 = vsel %vm617_vm0, %v447_v16, %v518_v0 }
  0xb1   : > { %1601 = vmatmul.msk.f32.gmra.mxu0 %vm661_vm2, %v638_v1  ;;  %v641_v23 = vsel %vm634_vm1, %v624_v19, %v582_v63 }
  0xb7   : > { %v526_v5 = vpop.permute.xlu1 %525  ;;  %v584_v6 = vpop.permute.xlu0 %583 }
  0xb8   : > { %v628_v7 = vsel %vm617_vm0, %v451_v4, %v526_v5  ;;  %v596_v26 = vpop.permute.xlu2 %595  ;;  %v642_v32 = vsel %vm634_vm1, %v625_v27, %v584_v6 }
  0xb9   : > { %1602 = vmatmul.msk.f32.gmra.mxu0 %vm661_vm2, %v639_v8  ;;  %v645_v10 = vsel %vm634_vm1, %v628_v7, %v590_v62 }
  0xba   : > { %1608 = vmatmul.msk.f32.vlgmr.msra.gmra.mxu2 %vm661_vm2, %v645_v10 }
  0xbf   : > { %v586_v13 = vpop.permute.xlu1 %585  ;;  %v522_v14 = vpop.permute.xlu0 %521 }
  0xc0   : > { %v626_v36 = vsel %vm617_vm0, %v449_v34, %v522_v14  ;;  %v598_v39 = vpop.permute.xlu2 %597 }
  0xc1   : > { %1603 = vmatmul.msk.f32.gmra.mxu0 %vm661_vm2, %v640_v15  ;;  %v643_v43 = vsel %vm634_vm1, %v626_v36, %v586_v13 }
  0xc7   : > { %v524_v21 = vpop.permute.xlu1 %523  ;;  %v592_v22 = vpop.permute.xlu0 %591 }
  0xc8   : > { %v646_v24 = vsel %vm634_vm1, %v629_v20, %v592_v22  ;;  %v627_v47 = vsel %vm617_vm0, %v450_v46, %v524_v21 }
  0xc9   : > { %1604 = vmatmul.msk.f32.gmra.mxu0 %vm661_vm2, %v641_v23  ;;  %1609 = vmatmul.msk.f32.gmra.mxu2 %vm661_vm2, %v646_v24  ;;  %v644_v52 = vsel %vm634_vm1, %v627_v47, %v588_v18 }
  0xcf   : > { %v530_v29 = vpop.permute.xlu1 %529  ;;  %v532_v30 = vpop.permute.xlu0 %531 }
  0xd0   : > { %v631_v31 = vsel %vm617_vm0, %v454_v28, %v532_v30  ;;  %v630_v37 = vsel %vm617_vm0, %v453_v35, %v530_v29 }
  0xd1   : > { %1605 = vmatmul.msk.f32.gmra.mxu0 %vm661_vm2, %v642_v32  ;;  %v648_v33 = vsel %vm634_vm1, %v631_v31, %v596_v26 }
  0xd2   : > { %1611 = vmatmul.msk.f32.vlgmr.msra.gmra.mxu3 %vm661_vm2, %v648_v33 }
  0xd7   : > { %v534_v40 = vpop.permute.xlu1 %533  ;;  %v594_v41 = vpop.permute.xlu0 %593 }
  0xd8   : > { %v632_v42 = vsel %vm617_vm0, %v455_v38, %v534_v40  ;;  %v647_v44 = vsel %vm634_vm1, %v630_v37, %v594_v41 }
  0xd9   : > { %1606 = vmatmul.msk.f32.gmra.mxu0 %vm661_vm2, %v643_v43  ;;  %1610 = vmatmul.msk.f32.gmra.mxu2 %vm661_vm2, %v647_v44  ;;  %v649_v45 = vsel %vm634_vm1, %v632_v42, %v598_v39 }
  0xda   : > { %1612 = vmatmul.msk.f32.gmra.mxu3 %vm661_vm2, %v649_v45 }
  0xdf   : > { %v536_v49 = vpop.permute.xlu0 %535  ;;  %v600_v50 = vpop.permute.xlu1 %599 }
  0xe0   : > { %v633_v51 = vsel %vm617_vm0, %v456_v48, %v536_v49 }
  0xe1   : > { %1607 = vmatmul.msk.f32.gmra.mxu0 %vm661_vm2, %v644_v52  ;;  %v650_v53 = vsel %vm634_vm1, %v633_v51, %v600_v50 }
  0xe2   : > { %1613 = vmatmul.msk.f32.gmra.mxu3 %vm661_vm2, %v650_v53 }
 0x116   : > { %v727_v55 = vpop.f32.mrf.mxu0 }
 0x117   : > { %v728_v56 = vadd.f32 %v2132_v54, %v727_v55 }
 0x119   : > { %v791_v57 = vmin.f32 %v728_v56, 0.0  ;;  %vm775_vm3 = vcmp.gt.f32.partialorder %v728_v56, 0.0 }
 0x11b   : > { %v807_v58 = vmul.f32 1.442695, %v791_v57 }
 0x11d   : > { %1728 = vpow2.f32 %v807_v58 }
 0x11e   : > { %v730_v59 = vpop.f32.mrf.mxu0 }
 0x11f   : > { %v731_v60 = vadd.f32 %v2132_v54, %v730_v59 }
 0x121   : > { %v792_v61 = vmin.f32 %v731_v60, 0.0  ;;  %vm776_vm4 = vcmp.gt.f32.partialorder %v731_v60, 0.0 }
 0x123   : > { %v1729_v62 = vpop.eup %1728  ;;  %v809_v63 = vmul.f32 1.442695, %v792_v61 }
 0x124   : > { %v1614_v0 = vadd.f32 -1.0, %v1729_v62 }
 0x125   : > { %1730 = vpow2.f32 %v809_v63 }
 0x126   : > { %v855_v1 = vsel %vm775_vm3, %v728_v56, %v1614_v0  ;;  %v733_v2 = vpop.f32.mrf.mxu0 }
 0x127   : > { %871 = vst.msk [vmem:[#allocation2] sm:$0xff] %vm634_vm1, %v855_v1  ;;  %v734_v3 = vadd.f32 %v2132_v54, %v733_v2 }
 0x129   : > { %v793_v4 = vmin.f32 %v734_v3, 0.0  ;;  %vm777_vm5 = vcmp.gt.f32.partialorder %v734_v3, 0.0 }
 0x12b   : > { %v1731_v5 = vpop.eup %1730  ;;  %v811_v6 = vmul.f32 1.442695, %v793_v4 }
 0x12c   : > { %v1615_v7 = vadd.f32 -1.0, %v1731_v5 }
 0x12d   : > { %1732 = vpow2.f32 %v811_v6 }
 0x12e   : > { %v856_v8 = vsel %vm776_vm4, %v731_v60, %v1615_v7  ;;  %v736_v9 = vpop.f32.mrf.mxu0  ;;  %vm886_vm4 = vcmask 259072  }
 0x12f   : > { %872 = vst.msk [vmem:[#allocation2 + $0x8] sm:$0xff] %vm634_vm1, %v856_v8  ;;  %v737_v10 = vadd.f32 %v2132_v54, %v736_v9 }
 0x131   : > { %v794_v11 = vmin.f32 %v737_v10, 0.0  ;;  %vm778_vm6 = vcmp.gt.f32.partialorder %v737_v10, 0.0 }
 0x133   : > { %v1733_v12 = vpop.eup %1732  ;;  %v813_v13 = vmul.f32 1.442695, %v794_v11 }
 0x134   : > { %v1616_v14 = vadd.f32 -1.0, %v1733_v12 }
 0x135   : > { %1734 = vpow2.f32 %v813_v13 }
 0x136   : > { %v857_v15 = vsel %vm777_vm5, %v734_v3, %v1616_v14  ;;  %v739_v16 = vpop.f32.mrf.mxu0  ;;  %v904_v17 = vld [vmem:[#allocation2 + $0x1] ss:$2 sm:$0xff]  ;;  %vm1007_vm5 = vcmask 523264  }
 0x137   : > { %873 = vst.msk [vmem:[#allocation2 + $0x10] sm:$0xff] %vm634_vm1, %v857_v15  ;;  %v740_v18 = vadd.f32 %v2132_v54, %v739_v16  ;;  %943 = vrot.lane.b32.xlu2 %v904_v17, %s2468_s15 }
 0x139   : > { %v795_v19 = vmin.f32 %v740_v18, 0.0  ;;  %vm779_vm7 = vcmp.gt.f32.partialorder %v740_v18, 0.0 }
 0x13b   : > { %v1735_v20 = vpop.eup %1734  ;;  %v815_v21 = vmul.f32 1.442695, %v795_v19 }
 0x13c   : > { %v1617_v22 = vadd.f32 -1.0, %v1735_v20 }
 0x13d   : > { %1736 = vpow2.f32 %v815_v21  ;;  %v757_v23 = vpop.f32.mrf.mxu2 }
 0x13e   : > { %v858_v24 = vsel %vm778_vm6, %v737_v10, %v1617_v22  ;;  %v742_v25 = vpop.f32.mrf.mxu0  ;;  %v920_v26 = vld [vmem:[#allocation2 + $0x2] ss:$2 sm:$0xff]  ;;  %v758_v27 = vadd.f32 %v2132_v54, %v757_v23  ;;  %vm1032_vm6 = vcmask 785408  }
 0x13f   : > { %874 = vst.msk [vmem:[#allocation2 + $0x18] sm:$0xff] %vm634_vm1, %v858_v24  ;;  %v743_v28 = vadd.f32 %v2132_v54, %v742_v25  ;;  %975 = vrot.lane.b32.xlu0 %v920_v26, %s2466_s24 }
 0x140   : > { %v801_v29 = vmin.f32 %v758_v27, 0.0  ;;  %vm785_vm8 = vcmp.gt.f32.partialorder %v758_v27, 0.0 }
 0x141   : > { %v796_v30 = vmin.f32 %v743_v28, 0.0  ;;  %vm780_vm9 = vcmp.gt.f32.partialorder %v743_v28, 0.0 }
 0x142   : > { %v827_v31 = vmul.f32 1.442695, %v801_v29 }
 0x143   : > { %v1737_v32 = vpop.eup %1736  ;;  %v817_v33 = vmul.f32 1.442695, %v796_v30 }
 0x144   : > { %v1618_v34 = vadd.f32 -1.0, %v1737_v32  ;;  %1738 = vpow2.f32 %v827_v31 }
 0x145   : > { %1740 = vpow2.f32 %v817_v33 }
 0x146   : > { %v859_v35 = vsel %vm779_vm7, %v740_v18, %v1618_v34  ;;  %v745_v36 = vpop.f32.mrf.mxu0  ;;  %v906_v37 = vld [vmem:[#allocation2 + $0x11] ss:$2 sm:$0xff] }
 0x147   : > { %875 = vst.msk [vmem:[#allocation2 + $0x20] sm:$0xff] %vm634_vm1, %v859_v35  ;;  %v746_v38 = vadd.f32 %v2132_v54, %v745_v36  ;;  %945 = vrot.lane.b32.xlu1 %v906_v37, %s2468_s15 }
 0x149   : > { %v797_v39 = vmin.f32 %v746_v38, 0.0  ;;  %vm781_vm10 = vcmp.gt.f32.partialorder %v746_v38, 0.0 }
 0x14a   : > { %v1739_v40 = vpop.eup %1738 }
 0x14b   : > { %v1741_v41 = vpop.eup %1740  ;;  %v1624_v42 = vadd.f32 -1.0, %v1739_v40  ;;  %v819_v43 = vmul.f32 1.442695, %v797_v39 }
 0x14c   : > { %v1619_v44 = vadd.f32 -1.0, %v1741_v41  ;;  %v760_v45 = vpop.f32.mrf.mxu2 }
 0x14d   : > { %v865_v46 = vsel %vm785_vm8, %v758_v27, %v1624_v42  ;;  %1742 = vpow2.f32 %v819_v43  ;;  %v761_v47 = vadd.f32 %v2132_v54, %v760_v45  ;;  %v1027_v45 = vld [vmem:[%s2480_s3 + $0x58] sm:$0xff] }
 0x14e   : > { %v860_v48 = vsel %vm780_vm9, %v743_v28, %v1619_v44  ;;  %881 = vst.msk [vmem:[#allocation2 + $0x50] sm:$0xff] %vm634_vm1, %v865_v46  ;;  %v748_v49 = vpop.f32.mrf.mxu0  ;;  %v922_v50 = vld [vmem:[#allocation2 + $0x12] ss:$2 sm:$0xff]  ;;  %1061 = vmatpush.msra.mxu1 %v1027_v45 }
 0x14f   : > { %876 = vst.msk [vmem:[#allocation2 + $0x28] sm:$0xff] %vm634_vm1, %v860_v48  ;;  %v802_v51 = vmin.f32 %v761_v47, 0.0  ;;  %v749_v52 = vadd.f32 %v2132_v54, %v748_v49  ;;  %977 = vrot.lane.b32.xlu2 %v922_v50, %s2466_s24  ;;  %vm786_vm11 = vcmp.gt.f32.partialorder %v761_v47, 0.0  ;;  %v1026_v46 = vld [vmem:[%s2480_s3 + $0x50] sm:$0xff]  ;;  %v1025_v50 = vld [vmem:[%s2480_s3 + $0x48] sm:$0xff] }
 0x150   : > { %1062 = vmatpush.msra.mxu1 %v1026_v46 }
 0x151   : > { %v829_v53 = vmul.f32 1.442695, %v802_v51  ;;  %v798_v55 = vmin.f32 %v749_v52, 0.0  ;;  %vm782_vm12 = vcmp.gt.f32.partialorder %v749_v52, 0.0 }
 0x152   : > { %1063 = vmatpush.msra.mxu1 %v1025_v50 }
 0x153   : > { %v1743_v56 = vpop.eup %1742  ;;  %1744 = vpow2.f32 %v829_v53  ;;  %v821_v57 = vmul.f32 1.442695, %v798_v55  ;;  %v1024_v53 = vld [vmem:[%s2480_s3 + $0x40] sm:$0xff]  ;;  %v1023_v55 = vld [vmem:[%s2480_s3 + $0x38] sm:$0xff] }
 0x154   : > { %v1620_v58 = vadd.f32 -1.0, %v1743_v56  ;;  %1064 = vmatpush.msra.mxu1 %v1024_v53  ;;  %v1022_v56 = vld [vmem:[%s2480_s3 + $0x30] sm:$0xff] }
 0x155   : > { %1746 = vpow2.f32 %v821_v57  ;;  %v766_v59 = vpop.f32.mrf.mxu3  ;;  %v1021_v57 = vld [vmem:[%s2480_s3 + $0x28] sm:$0xff] }
 0x156   : > { %v861_v60 = vsel %vm781_vm10, %v746_v38, %v1620_v58  ;;  %v767_v61 = vadd.f32 %v2132_v54, %v766_v59  ;;  %v751_v62 = vpop.f32.mrf.mxu0  ;;  %v908_v63 = vld [vmem:[#allocation2 + $0x21] ss:$2 sm:$0xff]  ;;  %1065 = vmatpush.msra.mxu1 %v1023_v55 }
 0x157   : > { %877 = vst.msk [vmem:[#allocation2 + $0x30] sm:$0xff] %vm634_vm1, %v861_v60  ;;  %v752_v0 = vadd.f32 %v2132_v54, %v751_v62  ;;  %947 = vrot.lane.b32.xlu0 %v908_v63, %s2468_s15  ;;  %v1020_v63 = vld [vmem:[%s2480_s3 + $0x20] sm:$0xff] }
 0x158   : > { %v804_v1 = vmin.f32 %v767_v61, 0.0  ;;  %vm788_vm13 = vcmp.gt.f32.partialorder %v767_v61, 0.0  ;;  %1066 = vmatpush.msra.mxu1 %v1022_v56 }
 0x159   : > { %v1745_v2 = vpop.eup %1744  ;;  %v799_v3 = vmin.f32 %v752_v0, 0.0  ;;  %vm783_vm14 = vcmp.gt.f32.partialorder %v752_v0, 0.0 }
 0x15a   : > { %v1625_v4 = vadd.f32 -1.0, %v1745_v2  ;;  %v833_v5 = vmul.f32 1.442695, %v804_v1  ;;  %1067 = vmatpush.msra.mxu1 %v1021_v57  ;;  %v1018_v1 = vld [vmem:[%s2480_s3 + $0x10] sm:$0xff]  ;;  %v1017_v2 = vld [vmem:[%s2480_s3 + $0x8] sm:$0xff] }
 0x15b   : > { %v1747_v6 = vpop.eup %1746  ;;  %v823_v7 = vmul.f32 1.442695, %v799_v3  ;;  %v1016_v3 = vld [vmem:[%s2480_s3] sm:$0xff] }
 0x15c   : > { %v866_v8 = vsel %vm786_vm11, %v761_v47, %v1625_v4  ;;  %v1621_v9 = vadd.f32 -1.0, %v1747_v6  ;;  %1748 = vpow2.f32 %v833_v5  ;;  %v763_v10 = vpop.f32.mrf.mxu2  ;;  %1068 = vmatpush.msra.mxu1 %v1020_v63  ;;  %v888_v5 = vld [vmem:[#allocation2] ss:$2 sm:$0xff] }
 0x15d   : > { %882 = vst.msk [vmem:[#allocation2 + $0x58] sm:$0xff] %vm634_vm1, %v866_v8  ;;  %1750 = vpow2.f32 %v823_v7  ;;  %v764_v11 = vadd.f32 %v2132_v54, %v763_v10  ;;  %v769_v12 = vpop.f32.mrf.mxu3  ;;  %v890_v10 = vld [vmem:[#allocation2 + $0x10] ss:$2 sm:$0xff] }
 0x15e   : > { %v862_v13 = vsel %vm782_vm12, %v749_v52, %v1621_v9  ;;  %v770_v14 = vadd.f32 %v2132_v54, %v769_v12  ;;  %v754_v15 = vpop.f32.mrf.mxu0  ;;  %v924_v16 = vld [vmem:[#allocation2 + $0x22] ss:$2 sm:$0xff] }
 0x15f   : > { %878 = vst.msk [vmem:[#allocation2 + $0x38] sm:$0xff] %vm634_vm1, %v862_v13  ;;  %v803_v17 = vmin.f32 %v764_v11, 0.0  ;;  %v755_v18 = vadd.f32 %v2132_v54, %v754_v15  ;;  %979 = vrot.lane.b32.xlu1 %v924_v16, %s2466_s24  ;;  %vm787_vm0 = vcmp.gt.f32.partialorder %v764_v11, 0.0  ;;  %v892_v15 = vld [vmem:[#allocation2 + $0x20] ss:$2 sm:$0xff] }
 0x160   : > { %v805_v19 = vmin.f32 %v770_v14, 0.0  ;;  %vm789_vm15 = vcmp.gt.f32.partialorder %v770_v14, 0.0 }
 0x161   : > { %v831_v20 = vmul.f32 1.442695, %v803_v17  ;;  %v800_v21 = vmin.f32 %v755_v18, 0.0  ;;  %vm784_vm2 = vcmp.gt.f32.partialorder %v755_v18, 0.0 }
 0x162   : > { %v1749_v22 = vpop.eup %1748  ;;  %v835_v23 = vmul.f32 1.442695, %v805_v19 }
 0x163   : > { %v1751_v24 = vpop.eup %1750  ;;  %v1627_v25 = vadd.f32 -1.0, %v1749_v22  ;;  %1752 = vpow2.f32 %v831_v20  ;;  %v825_v26 = vmul.f32 1.442695, %v800_v21 }
 0x164   : > { %v1622_v27 = vadd.f32 -1.0, %v1751_v24  ;;  %1754 = vpow2.f32 %v835_v23  ;;  %v914_v49 = vld [vmem:[#allocation2 + $0x51] ss:$2 sm:$0xff] }
 0x165   : > { %v868_v28 = vsel %vm788_vm13, %v767_v61, %v1627_v25  ;;  %1756 = vpow2.f32 %v825_v26  ;;  %v772_v29 = vpop.f32.mrf.mxu3 }
 0x166   : > { %884 = vst.msk [vmem:[#allocation2 + $0x68] sm:$0xff] %vm634_vm1, %v868_v28  ;;  %v863_v30 = vsel %vm783_vm14, %v752_v0, %v1622_v27  ;;  %v773_v31 = vadd.f32 %v2132_v54, %v772_v29  ;;  %v910_v32 = vld [vmem:[#allocation2 + $0x31] ss:$2 sm:$0xff]  ;;  %v894_v20 = vld [vmem:[#allocation2 + $0x30] ss:$2 sm:$0xff] }
 0x167   : > { %879 = vst.msk [vmem:[#allocation2 + $0x40] sm:$0xff] %vm634_vm1, %v863_v30  ;;  %949 = vrot.lane.b32.xlu2 %v910_v32, %s2468_s15  ;;  %v1019_v0 = vld [vmem:[%s2480_s3 + $0x18] sm:$0xff] }
 0x168   : > { %v806_v33 = vmin.f32 %v773_v31, 0.0  ;;  %vm790_vm3 = vcmp.gt.f32.partialorder %v773_v31, 0.0  ;;  %1069 = vmatpush.msra.mxu1 %v1019_v0  ;;  %v898_v30 = vld [vmem:[#allocation2 + $0x50] ss:$2 sm:$0xff] }
 0x169   : > { %v1753_v34 = vpop.eup %1752 }
 0x16a   : > { %v1755_v35 = vpop.eup %1754  ;;  %v1626_v36 = vadd.f32 -1.0, %v1753_v34  ;;  %v837_v37 = vmul.f32 1.442695, %v806_v33  ;;  %1070 = vmatpush.msra.mxu1 %v1018_v1 }
 0x16b   : > { %v1757_v38 = vpop.eup %1756  ;;  %v1628_v39 = vadd.f32 -1.0, %v1755_v35 }
 0x16c   : > { %v867_v40 = vsel %vm787_vm0, %v764_v11, %v1626_v36  ;;  %v1623_v41 = vadd.f32 -1.0, %v1757_v38  ;;  %1758 = vpow2.f32 %v837_v37  ;;  %1071 = vmatpush.msra.mxu1 %v1017_v2 }
 0x16d   : > { %883 = vst.msk [vmem:[#allocation2 + $0x60] sm:$0xff] %vm634_vm1, %v867_v40  ;;  %v869_v54 = vsel %vm789_vm15, %v770_v14, %v1628_v39 }
 0x16e   : > { %885 = vst.msk [vmem:[#allocation2 + $0x70] sm:$0xff] %vm634_vm1, %v869_v54  ;;  %v864_v42 = vsel %vm784_vm2, %v755_v18, %v1623_v41  ;;  %v926_v43 = vld [vmem:[#allocation2 + $0x32] ss:$2 sm:$0xff]  ;;  %1072 = vmatpush.msra.mxu1 %v1016_v3 }
 0x16f   : > { %880 = vst.msk [vmem:[#allocation2 + $0x48] sm:$0xff] %vm634_vm1, %v864_v42  ;;  %981 = vrot.lane.b32.xlu0 %v926_v43, %s2466_s24  ;;  %v2245_v43 = vld [vmem:[%s2456_s4] ss:$0 sm:$0xff] }
 0x172   : > { %v1759_v44 = vpop.eup %1758 }
 0x173   : > { %v1629_v47 = vadd.f32 -1.0, %v1759_v44 }
 0x174   : > { %v930_v58 = vld [vmem:[#allocation2 + $0x52] ss:$2 sm:$0xff]  ;;  %v916_v60 = vld [vmem:[#allocation2 + $0x61] ss:$2 sm:$0xff] }
 0x175   : > { %v870_v48 = vsel %vm790_vm3, %v773_v31, %v1629_v47  ;;  %v932_v59 = vld [vmem:[#allocation2 + $0x62] ss:$2 sm:$0xff] }
 0x176   : > { %887 = vst.msk [vmem:[#allocation2 + $0x78] sm:$0x3f] %vm886_vm4, %v870_v48  ;;  %v912_v51 = vld [vmem:[#allocation2 + $0x41] ss:$2 sm:$0xff]  ;;  %v928_v52 = vld [vmem:[#allocation2 + $0x42] ss:$2 sm:$0xff] }
 0x177   : > { %951 = vrot.lane.b32.xlu1 %v912_v51, %s2468_s15  ;;  %953 = vrot.lane.b32.xlu0 %v914_v49, %s2468_s15  ;;  %v896_v24 = vld [vmem:[#allocation2 + $0x40] ss:$2 sm:$0xff] }
 0x178   : > { %983 = vrot.lane.b32.xlu2 %v928_v52, %s2466_s24  ;;  %v900_v36 = vld [vmem:[#allocation2 + $0x60] ss:$2 sm:$0xff] }
 0x17d   : > { %v918_v61 = vld [vmem:[#allocation2 + $0x71] ss:$2 sm:$0x3f]  ;;  %v934_v62 = vld [vmem:[#allocation2 + $0x72] ss:$2 sm:$0x3f] }
 0x17e   : > { %v902_v40 = vld [vmem:[#allocation2 + $0x70] ss:$2 sm:$0x3f] }
 0x17f   : > { %985 = vrot.lane.b32.xlu1 %v930_v58, %s2466_s24  ;;  %987 = vrot.lane.b32.xlu0 %v932_v59, %s2466_s24 }
 0x180   : > { %955 = vrot.lane.b32.xlu2 %v916_v60, %s2468_s15 }
 0x187   : > { %957 = vrot.lane.b32.xlu1 %v918_v61, %s2468_s15 }
 0x188   : > { %989 = vrot.lane.b32.xlu2 %v934_v62, %s2466_s24  ;;  %s1527_s24 = scalar_lea.hbm %s2465_s13, %s1665_s21 }
 0x189   : > { %s1531_s20 = sshll.u32 %s1527_s24, 4  ;;  %s1532_s20 = int_to_ptr.hbm [resolvable:$true] %s1531_s20 }
 0x18a   : > { %s1806_s29 = sshra.s32 %s1532_s20, 4  ;;  %s1807_s29 = int_to_ptr.hbm [resolvable:$true] %s1806_s29 }
 0x18b   : > { %s1808_s3 = scalar_lea.hbm %s1807_s29, 4  ;;  %p1813_p0 = scmp.lt.s32.totalorder %s1807_s29, %s2465_s13 }
 0x18c   : > { %p1809_p11 = scmp.ne.s32.totalorder %s1807_s29, %s1808_s3 }
 0x18e   : > { %p1810_p12 = pnand %p1809_p11, %p1967_p5 }
 0x190   : > { %p1811_p13 = pneg %p1810_p12 }
 0x191   : > { %v944_v4 = vpop.permute.xlu2 %943 }
 0x192   : > { %v999_v6 = vsel %vm634_vm1, %v888_v5, %v944_v4 }
 0x1a9   : > { %v978_v11 = vpop.permute.xlu2 %977 }
 0x1b1   : > { %v976_v7 = vpop.permute.xlu0 %975 }
 0x1b2   : > { %v1008_v8 = vsel %vm1007_vm5, %v999_v6, %v976_v7 }
 0x1b3   : > { %1630 = vmatmul.msk.f32.vlgmr.msra.gmra.mxu1 %vm1032_vm6, %v1008_v8 }
 0x1b9   : > { %v946_v9 = vpop.permute.xlu1 %945 }
 0x1ba   : > { %v1000_v12 = vsel %vm634_vm1, %v890_v10, %v946_v9 }
 0x1bb   : > { %v1009_v13 = vsel %vm1007_vm5, %v1000_v12, %v978_v11 }
 0x1bc   : > { %1631 = vmatmul.msk.f32.gmra.mxu1 %vm1032_vm6, %v1009_v13 }
 0x1c1   : > { %v950_v19 = vpop.permute.xlu2 %949 }
 0x1c2   : > { %v1002_v21 = vsel %vm634_vm1, %v894_v20, %v950_v19 }
 0x1c9   : > { %v948_v14 = vpop.permute.xlu0 %947 }
 0x1ca   : > { %v1001_v16 = vsel %vm634_vm1, %v892_v15, %v948_v14 }
 0x1d1   : > { %v980_v17 = vpop.permute.xlu1 %979 }
 0x1d2   : > { %v1010_v18 = vsel %vm1007_vm5, %v1001_v16, %v980_v17  ;;  %v984_v26 = vpop.permute.xlu2 %983 }
 0x1d3   : > { %1632 = vmatmul.msk.f32.gmra.mxu1 %vm1032_vm6, %v1010_v18 }
 0x1da   : > { %v956_v34 = vpop.permute.xlu2 %955 }
 0x1db   : > { %v1005_v37 = vsel %vm634_vm1, %v900_v36, %v956_v34 }
 0x1e1   : > { %v982_v22 = vpop.permute.xlu0 %981 }
 0x1e2   : > { %v1011_v23 = vsel %vm1007_vm5, %v1002_v21, %v982_v22  ;;  %v990_v54 = vpop.permute.xlu2 %989 }
 0x1e3   : > { %1633 = vmatmul.msk.f32.gmra.mxu1 %vm1032_vm6, %v1011_v23 }
 0x1e9   : > { %v952_v25 = vpop.permute.xlu1 %951  ;;  %v954_v29 = vpop.permute.xlu0 %953 }
 0x1ea   : > { %v1003_v27 = vsel %vm634_vm1, %v896_v24, %v952_v25  ;;  %v1004_v31 = vsel %vm634_vm1, %v898_v30, %v954_v29 }
 0x1eb   : > { %v1012_v28 = vsel %vm1007_vm5, %v1003_v27, %v984_v26 }
 0x1ec   : > { %1634 = vmatmul.msk.f32.gmra.mxu1 %vm1032_vm6, %v1012_v28 }
 0x1f1   : > { %v986_v32 = vpop.permute.xlu1 %985  ;;  %v988_v35 = vpop.permute.xlu0 %987 }
 0x1f2   : > { %v1013_v33 = vsel %vm1007_vm5, %v1004_v31, %v986_v32  ;;  %v1014_v38 = vsel %vm1007_vm5, %v1005_v37, %v988_v35 }
 0x1f4   : > { %1635 = vmatmul.msk.f32.gmra.mxu1 %vm1032_vm6, %v1013_v33 }
 0x1f9   : > { %v958_v39 = vpop.permute.xlu1 %957 }
 0x1fa   : > { %v1006_v41 = vsel %vm634_vm1, %v902_v40, %v958_v39 }
 0x1fb   : > { %v1015_v42 = vsel %vm1007_vm5, %v1006_v41, %v990_v54 }
 0x1fc   : > { %1636 = vmatmul.msk.f32.gmra.mxu1 %vm1032_vm6, %v1014_v38 }
 0x204   : > { %1637 = vmatmul.msk.f32.gmra.mxu1 %vm1032_vm6, %v1015_v42 }
 0x230   : > { %v1074_v44 = vpop.f32.mrf.mxu1 }
 0x231   : > { %v1075_v45 = vadd.f32 %v2245_v43, %v1074_v44  ;;  %v1228_v44 = vld [vmem:[%s2457_s5 + $0x58] sm:$0xff] }
 0x232   : > { %1249 = vmatpush.msrb.mxu2 %v1228_v44 }
 0x233   : > { %v1106_v46 = vmin.f32 %v1075_v45, 0.0  ;;  %vm1098_vm7 = vcmp.gt.f32.partialorder %v1075_v45, 0.0 }
 0x235   : > { %v1114_v47 = vmul.f32 1.442695, %v1106_v46  ;;  %v1226_v46 = vld [vmem:[%s2457_s5 + $0x48] sm:$0xff] }
 0x237   : > { %1760 = vpow2.f32 %v1114_v47  ;;  %v1225_v47 = vld [vmem:[%s2457_s5 + $0x40] sm:$0xff] }
 0x239   : > { %v1077_v48 = vpop.f32.mrf.mxu1 }
 0x23a   : > { %v1078_v49 = vadd.f32 %v2245_v43, %v1077_v48  ;;  %v1224_v48 = vld [vmem:[%s2457_s5 + $0x38] sm:$0xff] }
 0x23c   : > { %v1107_v50 = vmin.f32 %v1078_v49, 0.0  ;;  %vm1099_vm8 = vcmp.gt.f32.partialorder %v1078_v49, 0.0 }
 0x23d   : > { %v1761_v51 = vpop.eup %1760 }
 0x23e   : > { %v1638_v52 = vadd.f32 -1.0, %v1761_v51  ;;  %v1116_v53 = vmul.f32 1.442695, %v1107_v50  ;;  %v1222_v50 = vld [vmem:[%s2457_s5 + $0x28] sm:$0xff]  ;;  %v1221_v51 = vld [vmem:[%s2457_s5 + $0x20] sm:$0xff] }
 0x240   : > { %v1138_v55 = vsel %vm1098_vm7, %v1075_v45, %v1638_v52  ;;  %1762 = vpow2.f32 %v1116_v53  ;;  %v1227_v45 = vld [vmem:[%s2457_s5 + $0x50] sm:$0xff]  ;;  %v1220_v52 = vld [vmem:[%s2457_s5 + $0x18] sm:$0xff]  ;;  %vm1438_vm7 = vcmask 257024  }
 0x241   : > { %1146 = vst.msk [vmem:[#allocation3] sm:$0xff] %vm634_vm1, %v1138_v55  ;;  %1250 = vmatpush.msrb.mxu2 %v1227_v45  ;;  %v1219_v53 = vld [vmem:[%s2457_s5 + $0x10] sm:$0xff]  ;;  %v1218_v55 = vld [vmem:[%s2457_s5 + $0x8] sm:$0xff] }
 0x243   : > { %1251 = vmatpush.msrb.mxu2 %v1226_v46 }
 0x245   : > { %1252 = vmatpush.msrb.mxu2 %v1225_v47 }
 0x246   : > { %v1763_v56 = vpop.eup %1762 }
 0x247   : > { %v1639_v57 = vadd.f32 -1.0, %v1763_v56  ;;  %1253 = vmatpush.msrb.mxu2 %v1224_v48  ;;  %v1217_v56 = vld [vmem:[%s2457_s5] sm:$0xff] }
 0x249   : > { %v1139_v58 = vsel %vm1099_vm8, %v1078_v49, %v1639_v57  ;;  %v1223_v49 = vld [vmem:[%s2457_s5 + $0x30] sm:$0xff] }
 0x24a   : > { %1147 = vst.msk [vmem:[#allocation3 + $0x8] sm:$0xff] %vm634_vm1, %v1139_v58  ;;  %1254 = vmatpush.msrb.mxu2 %v1223_v49  ;;  %v1365_v49 = vld [vmem:[%s2459_s7 + $0x58] sm:$0xff] }
 0x24b   : > { %1386 = vmatpush.msrb.mxu3 %v1365_v49 }
 0x24c   : > { %1255 = vmatpush.msrb.mxu2 %v1222_v50  ;;  %v1364_v50 = vld [vmem:[%s2459_s7 + $0x50] sm:$0xff] }
 0x24d   : > { %1387 = vmatpush.msrb.mxu3 %v1364_v50 }
 0x24e   : > { %1256 = vmatpush.msrb.mxu2 %v1221_v51  ;;  %v1363_v51 = vld [vmem:[%s2459_s7 + $0x48] sm:$0xff] }
 0x24f   : > { %1388 = vmatpush.msrb.mxu3 %v1363_v51 }
 0x250   : > { %v1080_v59 = vpop.f32.mrf.mxu1  ;;  %1257 = vmatpush.msrb.mxu2 %v1220_v52  ;;  %v1362_v52 = vld [vmem:[%s2459_s7 + $0x40] sm:$0xff] }
 0x251   : > { %v1081_v60 = vadd.f32 %v2245_v43, %v1080_v59  ;;  %v1162_v61 = vld [vmem:[#allocation3 + $0x1] ss:$2 sm:$0xff]  ;;  %v1154_v58 = vld [vmem:[#allocation3] ss:$2 sm:$0xff]  ;;  %1389 = vmatpush.msrb.mxu3 %v1362_v52 }
 0x252   : > { %1181 = vrot.lane.b32.xlu0 %v1162_v61, %s2481_s0  ;;  %1258 = vmatpush.msrb.mxu2 %v1219_v53  ;;  %v1361_v53 = vld [vmem:[%s2459_s7 + $0x38] sm:$0xff] }
 0x253   : > { %v1108_v62 = vmin.f32 %v1081_v60, 0.0  ;;  %vm1100_vm9 = vcmp.gt.f32.partialorder %v1081_v60, 0.0  ;;  %1390 = vmatpush.msrb.mxu3 %v1361_v53 }
 0x254   : > { %1259 = vmatpush.msrb.mxu2 %v1218_v55  ;;  %v1360_v55 = vld [vmem:[%s2459_s7 + $0x30] sm:$0xff] }
 0x255   : > { %v1118_v63 = vmul.f32 1.442695, %v1108_v62  ;;  %1391 = vmatpush.msrb.mxu3 %v1360_v55 }
 0x256   : > { %1260 = vmatpush.msrb.mxu2 %v1217_v56  ;;  %v1359_v56 = vld [vmem:[%s2459_s7 + $0x28] sm:$0xff] }
 0x257   : > { %1764 = vpow2.f32 %v1118_v63  ;;  %1392 = vmatpush.msrb.mxu3 %v1359_v56 }
 0x25d   : > { %v1765_v0 = vpop.eup %1764 }
 0x25e   : > { %v1640_v1 = vadd.f32 -1.0, %v1765_v0 }
 0x260   : > { %v1140_v2 = vsel %vm1100_vm9, %v1081_v60, %v1640_v1  ;;  %v1083_v3 = vpop.f32.mrf.mxu1  ;;  %vm1514_vm9 = vcmask 27648  }
 0x261   : > { %1148 = vst.msk [vmem:[#allocation3 + $0x10] sm:$0xff] %vm634_vm1, %v1140_v2  ;;  %v1084_v4 = vadd.f32 %v2245_v43, %v1083_v3 }
 0x263   : > { %v1109_v5 = vmin.f32 %v1084_v4, 0.0  ;;  %vm1101_vm10 = vcmp.gt.f32.partialorder %v1084_v4, 0.0 }
 0x265   : > { %v1120_v6 = vmul.f32 1.442695, %v1109_v5 }
 0x267   : > { %1766 = vpow2.f32 %v1120_v6 }
 0x268   : > { %v1170_v7 = vld [vmem:[#allocation3 + $0x2] ss:$2 sm:$0xff] }
 0x269   : > { %v1086_v8 = vpop.f32.mrf.mxu1  ;;  %1197 = vrot.lane.b32.xlu1 %v1170_v7, %s2482_s17 }
 0x26a   : > { %v1087_v9 = vadd.f32 %v2245_v43, %v1086_v8 }
 0x26c   : > { %v1110_v10 = vmin.f32 %v1087_v9, 0.0  ;;  %vm1102_vm11 = vcmp.gt.f32.partialorder %v1087_v9, 0.0 }
 0x26d   : > { %v1767_v11 = vpop.eup %1766 }
 0x26e   : > { %v1641_v12 = vadd.f32 -1.0, %v1767_v11  ;;  %v1122_v13 = vmul.f32 1.442695, %v1110_v10 }
 0x270   : > { %v1141_v14 = vsel %vm1101_vm10, %v1084_v4, %v1641_v12  ;;  %1768 = vpow2.f32 %v1122_v13  ;;  %v1724_v13 = vld [vmem:[%s2458_s6] ss:$0 sm:$0xff] }
 0x271   : > { %1149 = vst.msk [vmem:[#allocation3 + $0x18] sm:$0xff] %vm634_vm1, %v1141_v14  ;;  %v1089_v15 = vpop.f32.mrf.mxu1 }
 0x272   : > { %v1090_v16 = vadd.f32 %v2245_v43, %v1089_v15 }
 0x274   : > { %v1111_v17 = vmin.f32 %v1090_v16, 0.0  ;;  %vm1103_vm12 = vcmp.gt.f32.partialorder %v1090_v16, 0.0 }
 0x276   : > { %v1769_v18 = vpop.eup %1768  ;;  %v1124_v19 = vmul.f32 1.442695, %v1111_v17 }
 0x277   : > { %v1642_v20 = vadd.f32 -1.0, %v1769_v18 }
 0x278   : > { %1770 = vpow2.f32 %v1124_v19  ;;  %v1164_v21 = vld [vmem:[#allocation3 + $0x11] ss:$2 sm:$0xff]  ;;  %v1156_v63 = vld [vmem:[#allocation3 + $0x10] ss:$2 sm:$0xff] }
 0x279   : > { %v1142_v22 = vsel %vm1102_vm11, %v1087_v9, %v1642_v20  ;;  %v1092_v23 = vpop.f32.mrf.mxu1  ;;  %1183 = vrot.lane.b32.xlu2 %v1164_v21, %s2481_s0 }
 0x27a   : > { %1150 = vst.msk [vmem:[#allocation3 + $0x20] sm:$0xff] %vm634_vm1, %v1142_v22  ;;  %v1093_v24 = vadd.f32 %v2245_v43, %v1092_v23 }
 0x27c   : > { %v1112_v25 = vmin.f32 %v1093_v24, 0.0  ;;  %vm1104_vm13 = vcmp.gt.f32.partialorder %v1093_v24, 0.0 }
 0x27e   : > { %v1771_v26 = vpop.eup %1770  ;;  %v1126_v27 = vmul.f32 1.442695, %v1112_v25 }
 0x27f   : > { %v1643_v28 = vadd.f32 -1.0, %v1771_v26 }
 0x280   : > { %1772 = vpow2.f32 %v1126_v27 }
 0x281   : > { %v1143_v29 = vsel %vm1103_vm12, %v1090_v16, %v1643_v28  ;;  %v1095_v30 = vpop.f32.mrf.mxu1  ;;  %v1172_v31 = vld [vmem:[#allocation3 + $0x12] ss:$2 sm:$0xff] }
 0x282   : > { %1151 = vst.msk [vmem:[#allocation3 + $0x28] sm:$0xff] %vm634_vm1, %v1143_v29  ;;  %v1096_v32 = vadd.f32 %v2245_v43, %v1095_v30  ;;  %1199 = vrot.lane.b32.xlu0 %v1172_v31, %s2482_s17 }
 0x284   : > { %v1113_v33 = vmin.f32 %v1096_v32, 0.0  ;;  %vm1105_vm14 = vcmp.gt.f32.partialorder %v1096_v32, 0.0 }
 0x286   : > { %v1773_v34 = vpop.eup %1772  ;;  %v1128_v35 = vmul.f32 1.442695, %v1113_v33 }
 0x287   : > { %v1644_v36 = vadd.f32 -1.0, %v1773_v34 }
 0x288   : > { %1774 = vpow2.f32 %v1128_v35 }
 0x289   : > { %v1144_v37 = vsel %vm1104_vm13, %v1093_v24, %v1644_v36  ;;  %v1166_v38 = vld [vmem:[#allocation3 + $0x21] ss:$2 sm:$0xff]  ;;  %v1158_v3 = vld [vmem:[#allocation3 + $0x20] ss:$2 sm:$0xff] }
 0x28a   : > { %1152 = vst.msk [vmem:[#allocation3 + $0x30] sm:$0xff] %vm634_vm1, %v1144_v37  ;;  %1185 = vrot.lane.b32.xlu1 %v1166_v38, %s2481_s0 }
 0x28e   : > { %v1775_v39 = vpop.eup %1774 }
 0x28f   : > { %v1645_v40 = vadd.f32 -1.0, %v1775_v39 }
 0x291   : > { %v1145_v41 = vsel %vm1105_vm14, %v1096_v32, %v1645_v40  ;;  %v1174_v54 = vld [vmem:[#allocation3 + $0x22] ss:$2 sm:$0xff] }
 0x292   : > { %1153 = vst.msk [vmem:[#allocation3 + $0x38] sm:$0x3f] %vm886_vm4, %v1145_v41  ;;  %1201 = vrot.lane.b32.xlu2 %v1174_v54, %s2482_s17 }
 0x299   : > { %v1176_v42 = vld [vmem:[#allocation3 + $0x32] ss:$2 sm:$0x3f]  ;;  %v1168_v43 = vld [vmem:[#allocation3 + $0x31] ss:$2 sm:$0x3f] }
 0x29a   : > { %1203 = vrot.lane.b32.xlu1 %v1176_v42, %s2482_s17  ;;  %1187 = vrot.lane.b32.xlu0 %v1168_v43, %s2481_s0  ;;  %v1160_v9 = vld [vmem:[#allocation3 + $0x30] ss:$2 sm:$0x3f] }
 0x2c4   : > { %v1182_v57 = vpop.permute.xlu0 %1181 }
 0x2c5   : > { %v1209_v59 = vsel %vm634_vm1, %v1154_v58, %v1182_v57  ;;  %v1358_v57 = vld [vmem:[%s2459_s7 + $0x20] sm:$0xff]  ;;  %v1357_v58 = vld [vmem:[%s2459_s7 + $0x18] sm:$0xff] }
 0x2c6   : > { %1393 = vmatpush.msrb.mxu3 %v1358_v57 }
 0x2c8   : > { %1394 = vmatpush.msrb.mxu3 %v1357_v58 }
 0x2d3   : > { %v1184_v62 = vpop.permute.xlu2 %1183 }
 0x2d4   : > { %v1210_v0 = vsel %vm634_vm1, %v1156_v63, %v1184_v62 }
 0x2db   : > { %v1198_v60 = vpop.permute.xlu1 %1197 }
 0x2dc   : > { %v1213_v61 = vsel %vm1007_vm5, %v1209_v59, %v1198_v60  ;;  %v1356_v59 = vld [vmem:[%s2459_s7 + $0x10] sm:$0xff]  ;;  %v1355_v60 = vld [vmem:[%s2459_s7 + $0x8] sm:$0xff] }
 0x2dd   : > { %1646 = vmatmul.msk.f32.vlgmr.msrb.gmra.mxu2 %vm1032_vm6, %v1213_v61  ;;  %1395 = vmatpush.msrb.mxu3 %v1356_v59  ;;  %v1354_v61 = vld [vmem:[%s2459_s7] sm:$0xff] }
 0x2df   : > { %1396 = vmatpush.msrb.mxu3 %v1355_v60 }
 0x2e1   : > { %1397 = vmatpush.msrb.mxu3 %v1354_v61 }
 0x2ec   : > { %v1202_v5 = vpop.permute.xlu2 %1201 }
 0x2f4   : > { %v1200_v1 = vpop.permute.xlu0 %1199 }
 0x2f5   : > { %v1214_v2 = vsel %vm1007_vm5, %v1210_v0, %v1200_v1 }
 0x2f6   : > { %1647 = vmatmul.msk.f32.gmra.mxu2 %vm1032_vm6, %v1214_v2 }
 0x2fc   : > { %v1186_v4 = vpop.permute.xlu1 %1185 }
 0x2fd   : > { %v1211_v6 = vsel %vm634_vm1, %v1158_v3, %v1186_v4 }
 0x2fe   : > { %v1215_v7 = vsel %vm1007_vm5, %v1211_v6, %v1202_v5 }
 0x2ff   : > { %1648 = vmatmul.msk.f32.gmra.mxu2 %vm1032_vm6, %v1215_v7 }
 0x30c   : > { %v1204_v8 = vpop.permute.xlu1 %1203  ;;  %v1188_v10 = vpop.permute.xlu0 %1187 }
 0x30d   : > { %v1212_v11 = vsel %vm634_vm1, %v1160_v9, %v1188_v10 }
 0x30e   : > { %v1216_v12 = vsel %vm1007_vm5, %v1212_v11, %v1204_v8 }
 0x30f   : > { %1649 = vmatmul.msk.f32.gmra.mxu2 %vm1032_vm6, %v1216_v12 }
 0x360   : > { %v1262_v14 = vpop.f32.mrf.mxu2 }
 0x361   : > { %v1263_v15 = vadd.f32 %v1724_v13, %v1262_v14 }
 0x363   : > { %v1278_v16 = vmin.f32 %v1263_v15, 0.0  ;;  %vm1274_vm15 = vcmp.gt.f32.partialorder %v1263_v15, 0.0 }
 0x365   : > { %v1282_v17 = vmul.f32 1.442695, %v1278_v16 }
 0x367   : > { %1776 = vpow2.f32 %v1282_v17 }
 0x36d   : > { %v1777_v18 = vpop.eup %1776 }
 0x36e   : > { %v1650_v19 = vadd.f32 -1.0, %v1777_v18  ;;  %v1725_v18 = vld [vmem:[%s2460_s8] ss:$0 sm:$0xff] }
 0x370   : > { %v1294_v20 = vsel %vm1274_vm15, %v1263_v15, %v1650_v19 }
 0x371   : > { %1298 = vst.msk [vmem:[#allocation4] sm:$0xff] %vm634_vm1, %v1294_v20 }
 0x378   : > { %v1302_v63 = vld [vmem:[#allocation4] sm:$0xff] }
 0x379   : > { %v1265_v21 = vpop.f32.mrf.mxu2 }
 0x37a   : > { %v1266_v22 = vadd.f32 %v1724_v13, %v1265_v21 }
 0x37c   : > { %v1279_v23 = vmin.f32 %v1266_v22, 0.0  ;;  %vm1275_vm0 = vcmp.gt.f32.partialorder %v1266_v22, 0.0 }
 0x37e   : > { %v1284_v24 = vmul.f32 1.442695, %v1279_v23 }
 0x380   : > { %1778 = vpow2.f32 %v1284_v24 }
 0x382   : > { %v1268_v25 = vpop.f32.mrf.mxu2 }
 0x383   : > { %v1269_v26 = vadd.f32 %v1724_v13, %v1268_v25 }
 0x385   : > { %v1280_v27 = vmin.f32 %v1269_v26, 0.0  ;;  %vm1276_vm2 = vcmp.gt.f32.partialorder %v1269_v26, 0.0 }
 0x386   : > { %v1779_v28 = vpop.eup %1778 }
 0x387   : > { %v1651_v29 = vadd.f32 -1.0, %v1779_v28  ;;  %v1286_v30 = vmul.f32 1.442695, %v1280_v27 }
 0x389   : > { %v1295_v31 = vsel %vm1275_vm0, %v1266_v22, %v1651_v29  ;;  %1780 = vpow2.f32 %v1286_v30  ;;  %v1454_v30 = vld [vmem:[%s2461_s9 + $0x18] sm:$0xff] }
 0x38a   : > { %1299 = vst.msk [vmem:[#allocation4 + $0x8] sm:$0xff] %vm634_vm1, %v1295_v31  ;;  %v1453_v31 = vld [vmem:[%s2461_s9 + $0x10] sm:$0xff]  ;;  %1474 = vmatpush.msra.mxu2 %v1454_v30 }
 0x38c   : > { %1475 = vmatpush.msra.mxu2 %v1453_v31 }
 0x38f   : > { %v1781_v32 = vpop.eup %1780 }
 0x390   : > { %v1652_v33 = vadd.f32 -1.0, %v1781_v32  ;;  %v1452_v32 = vld [vmem:[%s2461_s9 + $0x8] sm:$0xff] }
 0x391   : > { %v1310_v34 = vld [vmem:[#allocation4 + $0x2] sm:$0xff]  ;;  %1476 = vmatpush.msra.mxu2 %v1452_v32 }
 0x392   : > { %v1306_v35 = vld [vmem:[#allocation4 + $0x1] sm:$0xff]  ;;  %v1296_v36 = vsel %vm1276_vm2, %v1269_v26, %v1652_v33  ;;  %v1271_v37 = vpop.f32.mrf.mxu2  ;;  %1334 = vrot.lane.b32.xlu0 %v1310_v34, %s2482_s17 }
 0x393   : > { %1318 = vrot.lane.b32.xlu2 %v1306_v35, %s2481_s0  ;;  %1300 = vst.msk [vmem:[#allocation4 + $0x10] sm:$0xff] %vm634_vm1, %v1296_v36  ;;  %v1272_v38 = vadd.f32 %v1724_v13, %v1271_v37  ;;  %v1303_v4 = vld [vmem:[#allocation4 + $0x8] sm:$0xff]  ;;  %v1451_v34 = vld [vmem:[%s2461_s9] sm:$0xff] }
 0x394   : > { %1477 = vmatpush.msra.mxu2 %v1451_v34 }
 0x395   : > { %v1281_v39 = vmin.f32 %v1272_v38, 0.0  ;;  %vm1277_vm3 = vcmp.gt.f32.partialorder %v1272_v38, 0.0 }
 0x397   : > { %v1288_v40 = vmul.f32 1.442695, %v1281_v39 }
 0x399   : > { %1782 = vpow2.f32 %v1288_v40 }
 0x39a   : > { %v1307_v41 = vld [vmem:[#allocation4 + $0x9] sm:$0xff] }
 0x39b   : > { %v1311_v54 = vld [vmem:[#allocation4 + $0xa] sm:$0xff]  ;;  %1320 = vrot.lane.b32.xlu1 %v1307_v41, %s2481_s0 }
 0x39c   : > { %1336 = vrot.lane.b32.xlu2 %v1311_v54, %s2482_s17  ;;  %v1304_v9 = vld [vmem:[#allocation4 + $0x10] sm:$0xff] }
 0x39f   : > { %v1783_v42 = vpop.eup %1782 }
 0x3a0   : > { %v1653_v43 = vadd.f32 -1.0, %v1783_v42  ;;  %v1486_v42 = vld [vmem:[%s2463_s11 + $0x18] sm:$0xff] }
 0x3a1   : > { %1506 = vmatpush.msra.mxu3 %v1486_v42 }
 0x3a2   : > { %v1297_v44 = vsel %vm1277_vm3, %v1272_v38, %v1653_v43  ;;  %v1485_v43 = vld [vmem:[%s2463_s11 + $0x10] sm:$0xff] }
 0x3a3   : > { %1301 = vst.msk [vmem:[#allocation4 + $0x18] sm:$0x3f] %vm886_vm4, %v1297_v44  ;;  %1507 = vmatpush.msra.mxu3 %v1485_v43 }
 0x3aa   : > { %v1312_v45 = vld [vmem:[#allocation4 + $0x12] sm:$0xff]  ;;  %v1313_v48 = vld [vmem:[#allocation4 + $0x1a] sm:$0xf] }
 0x3ab   : > { %v1308_v46 = vld [vmem:[#allocation4 + $0x11] sm:$0xff]  ;;  %v1309_v47 = vld [vmem:[#allocation4 + $0x19] sm:$0xf]  ;;  %1338 = vrot.lane.b32.xlu1 %v1312_v45, %s2482_s17  ;;  %v1484_v45 = vld [vmem:[%s2463_s11 + $0x8] sm:$0xff] }
 0x3ac   : > { %1322 = vrot.lane.b32.xlu0 %v1308_v46, %s2481_s0  ;;  %1324 = vrot.lane.b32.xlu2 %v1309_v47, %s2481_s0  ;;  %v1305_v14 = vld [vmem:[#allocation4 + $0x18] sm:$0xf]  ;;  %s432_s0 = sand.u32 1, %s1846_s26  }
 0x3ad   : > { %1508 = vmatpush.msra.mxu3 %v1484_v45  ;;  %s1517_s30 = scalar_lea.sflag [#allocation7], %s432_s0 }
 0x3b4   : > { %1340 = vrot.lane.b32.xlu0 %v1313_v48, %s2482_s17  ;;  %v1483_v48 = vld [vmem:[%s2463_s11] sm:$0xff]  ;;  %s1595_s17 = sshll.u32 %s432_s0, 2 }
 0x3b5   : > { %1509 = vmatpush.msra.mxu3 %v1483_v48  ;;  %s434_s23 = scalar_lea.vmem [#allocation6], %s1595_s17  ;;  %s1812_s17 = scalar_lea.hbm %s2465_s13, 8 }
 0x3b6   : > { %s1529_s16 = sshll.u32 %s434_s23, 4  ;;  %p1814_p1 = scmp.lt.s32.totalorder %s1812_s17, %s1808_s3  ;;  %s1530_s16 = int_to_ptr.vmem [resolvable:$true] %s1529_s16 }
 0x3b8   : > { %p1815_p2 = por %p1814_p1, %p1813_p0 }
 0x3ba   : > { %p1816_p3 = pnand %p1815_p2, %p1811_p13 }
 0x3ed   : > { %v1319_v62 = vpop.permute.xlu2 %1318 }
 0x3ee   : > { %v1346_v0 = vsel %vm634_vm1, %v1302_v63, %v1319_v62  ;;  %v1726_v63 = vld [vmem:[%s2462_s10] ss:$0 sm:$0xff] }
 0x3f6   : > { %v1337_v5 = vpop.permute.xlu2 %1336 }
 0x404   : > { %v1335_v1 = vpop.permute.xlu0 %1334 }
 0x405   : > { %v1350_v2 = vsel %vm1007_vm5, %v1346_v0, %v1335_v1 }
 0x406   : > { %1654 = vmatmul.msk.f32.vlgmr.msrb.gmra.mxu3 %vm1032_vm6, %v1350_v2  ;;  %v1325_v13 = vpop.permute.xlu2 %1324 }
 0x407   : > { %v1349_v15 = vsel %vm634_vm1, %v1305_v14, %v1325_v13 }
 0x40d   : > { %v1321_v3 = vpop.permute.xlu1 %1320 }
 0x40e   : > { %v1347_v6 = vsel %vm634_vm1, %v1303_v4, %v1321_v3  ;;  %v1727_v3 = vld [vmem:[%s2464_s12] ss:$0 sm:$0xff] }
 0x40f   : > { %v1351_v7 = vsel %vm1007_vm5, %v1347_v6, %v1337_v5 }
 0x410   : > { %1655 = vmatmul.msk.f32.gmra.mxu3 %vm1032_vm6, %v1351_v7 }
 0x41d   : > { %v1339_v8 = vpop.permute.xlu1 %1338 }
 0x41e   : > { %v1323_v10 = vpop.permute.xlu0 %1322 }
 0x41f   : > { %v1348_v11 = vsel %vm634_vm1, %v1304_v9, %v1323_v10 }
 0x420   : > { %v1352_v12 = vsel %vm1007_vm5, %v1348_v11, %v1339_v8 }
 0x421   : > { %1656 = vmatmul.msk.f32.gmra.mxu3 %vm1032_vm6, %v1352_v12 }
 0x426   : > { %v1341_v16 = vpop.permute.xlu0 %1340 }
 0x427   : > { %v1353_v17 = vsel %vm1007_vm5, %v1349_v15, %v1341_v16 }
 0x429   : > { %1657 = vmatmul.msk.f32.gmra.mxu3 %vm1032_vm6, %v1353_v17 }
 0x489   : > { %v1399_v19 = vpop.f32.mrf.mxu3 }
 0x48a   : > { %v1400_v20 = vadd.f32 %v1725_v18, %v1399_v19 }
 0x48c   : > { %v1415_v21 = vmin.f32 %v1400_v20, 0.0  ;;  %vm1411_vm4 = vcmp.gt.f32.partialorder %v1400_v20, 0.0 }
 0x48e   : > { %v1419_v22 = vmul.f32 1.442695, %v1415_v21 }
 0x490   : > { %1784 = vpow2.f32 %v1419_v22 }
 0x493   : > { %v1402_v23 = vpop.f32.mrf.mxu3 }
 0x494   : > { %v1403_v24 = vadd.f32 %v1725_v18, %v1402_v23 }
 0x496   : > { %v1785_v25 = vpop.eup %1784  ;;  %v1416_v26 = vmin.f32 %v1403_v24, 0.0  ;;  %vm1412_vm5 = vcmp.gt.f32.partialorder %v1403_v24, 0.0 }
 0x497   : > { %v1658_v27 = vadd.f32 -1.0, %v1785_v25 }
 0x498   : > { %v1421_v28 = vmul.f32 1.442695, %v1416_v26 }
 0x499   : > { %v1431_v29 = vsel %vm1411_vm4, %v1400_v20, %v1658_v27 }
 0x49a   : > { %1435 = vst.msk [vmem:[#allocation5] sm:$0xff] %vm634_vm1, %v1431_v29  ;;  %1786 = vpow2.f32 %v1421_v28 }
 0x4a0   : > { %v1787_v33 = vpop.eup %1786 }
 0x4a1   : > { %v1659_v35 = vadd.f32 -1.0, %v1787_v33 }
 0x4a3   : > { %v1432_v36 = vsel %vm1412_vm5, %v1403_v24, %v1659_v35 }
 0x4a4   : > { %v1405_v37 = vpop.f32.mrf.mxu3  ;;  %1436 = vst.msk [vmem:[#allocation5 + $0x8] sm:$0xff] %vm634_vm1, %v1432_v36 }
 0x4a5   : > { %v1406_v38 = vadd.f32 %v1725_v18, %v1405_v37 }
 0x4a7   : > { %v1417_v39 = vmin.f32 %v1406_v38, 0.0  ;;  %vm1413_vm6 = vcmp.gt.f32.partialorder %v1406_v38, 0.0 }
 0x4a9   : > { %v1423_v40 = vmul.f32 1.442695, %v1417_v39 }
 0x4ab   : > { %1788 = vpow2.f32 %v1423_v40 }
 0x4ac   : > { %v1408_v41 = vpop.f32.mrf.mxu3 }
 0x4ad   : > { %v1409_v54 = vadd.f32 %v1725_v18, %v1408_v41 }
 0x4af   : > { %v1418_v44 = vmin.f32 %v1409_v54, 0.0  ;;  %vm1414_vm8 = vcmp.gt.f32.partialorder %v1409_v54, 0.0 }
 0x4b1   : > { %v1789_v46 = vpop.eup %1788  ;;  %v1425_v47 = vmul.f32 1.442695, %v1418_v44 }
 0x4b2   : > { %v1660_v49 = vadd.f32 -1.0, %v1789_v46 }
 0x4b3   : > { %1790 = vpow2.f32 %v1425_v47 }
 0x4b4   : > { %v1433_v50 = vsel %vm1413_vm6, %v1406_v38, %v1660_v49 }
 0x4b5   : > { %1437 = vst.msk [vmem:[#allocation5 + $0x10] sm:$0xff] %vm634_vm1, %v1433_v50 }
 0x4b9   : > { %v1791_v51 = vpop.eup %1790 }
 0x4ba   : > { %v1661_v52 = vadd.f32 -1.0, %v1791_v51 }
 0x4bc   : > { %v1434_v53 = vsel %vm1414_vm8, %v1409_v54, %v1661_v52 }
 0x4bd   : > { %1439 = vst.msk [vmem:[#allocation5 + $0x18] sm:$0xf] %vm1438_vm7, %v1434_v53 }
 0x4c4   : > { %v1440_v55 = vld [vmem:[#allocation5] ss:$8 sm:$0xf]  ;;  %v1442_v56 = vld [vmem:[#allocation5 + $0x1] ss:$8 sm:$0xf] }
 0x4c5   : > { %v1443_v57 = vadd.f32 %v1442_v56, %v1440_v55  ;;  %v1445_v58 = vld [vmem:[#allocation5 + $0x2] ss:$8 sm:$0xf]  ;;  %v1448_v60 = vld [vmem:[#allocation5 + $0x3] ss:$8 sm:$0xf] }
 0x4c7   : > { %v1446_v59 = vadd.f32 %v1445_v58, %v1443_v57 }
 0x4c9   : > { %v1449_v61 = vadd.f32 %v1448_v60, %v1446_v59 }
 0x4cb   : > { %v1450_v62 = vmul.f32 0.25, %v1449_v61 }
 0x4cd   : > { %1662 = vmatmul.msk.f32.vlgmr.msra.gmra.mxu2 %vm634_vm1, %v1450_v62 }
 0x550   : > { %v1479_v0 = vpop.f32.mrf.mxu2 }
 0x551   : > { %v1480_v1 = vadd.f32 %v1726_v63, %v1479_v0 }
 0x553   : > { %v1482_v2 = vmax.f32 %v1480_v1, 0.0 }
 0x555   : > { %1663 = vmatmul.msk.f32.vlgmr.msra.gmra.mxu3 %vm634_vm1, %v1482_v2 }
 0x5d8   : > { %v1511_v4 = vpop.f32.mrf.mxu3 }
 0x5d9   : > { %v1512_v5 = vadd.f32 %v1727_v3, %v1511_v4 }
 0x5db   : > { %1515 = vst.msk [vmem:[%s434_s23] sm:$0xf] %vm1514_vm9, %v1512_v5 }
 0x5dc   : > { %1819 = shalt.err (!%p1816_p3)
}
 0x5dd   : > { %1680 = dma.vmem_to_hbm [thread:$0]  (%p1967_p5), %s1530_s16, 64, %s1532_s20, %s1517_s30  }
 0x5de PF: > { %p1686_p4 = scmp.ge.s32.totalorder %s1854_s28, 2  ;;  %s1543_s0 = sand.u32 1, %s1842_s25  }
 0x5df   : > { %s1544_s1 = scalar_lea.sflag [#allocation7], %s1543_s0 }
 0x5e0   : > { %p1683_p7 = pnand %p1686_p4, %p1971_p6 }
 0x5e2   : > { %p1684_p8 = pneg %p1683_p7 }
 0x5e4   : > { %1837 = dma.done.wait (%p1684_p8), %s1544_s1, 64  }
 0x5e5   : > { %1839 = vsyncadd (%p1684_p8), %s1544_s1, 4294967232  ;;  %s2483_s3 = sld [smem:[#allocation9_spill]]  ;;  %p23_p9 = scmp.ge.s32.totalorder %s1954_s14, 4  }
 0x5e6   : > { %s2484_s25 = smov %s1846_s26  ;;  %s2485_s26 = smov %s1850_s27 }
 0x5e7   : > { %s2487_s28 = smov %s1954_s14  ;;  %25 = sbr.rel (!%p23_p9) target bundleno = 8 (0x8), region = 144 }
 0x5eb   : > { %s2486_s27 = smov %s2483_s3 }
 0x5ec   :  { %1550 = vsyncpa [#allocation7], 1 }
 0x5ed   :  { %1552 = vsyncpa [#allocation7 + $0x1], 1 }

</bundles_post_ra>
